<compile_context>
chip_gen: v7x
topology: tpu7x:2x2x1
jax: 0.10.0
libtpu: 0.0.40
codegen_flags: <defaults>
</compile_context>

<pallas_src>
import functools

import jax
import jax.numpy as jnp
from jax.experimental import pallas as pl
from jax.experimental.pallas import tpu as pltpu

# ---- synthetic shapes / hyperparameters -------------------------------------
B, C, H, W = 2, 4, 16, 16
DIN = C * H * W            # 1024
HID = 32
FEAT = 8                   # feature_dim
K_QUEUE = 64               # K (queue length); K % B == 0 as the module asserts
M_MOMENTUM = 0.999

VMEM = pltpu.MemorySpace.VMEM
SMEM = pltpu.MemorySpace.SMEM


# ---- single fused Pallas kernel ----------------------------------------------
def _moco_fused_kernel(
    # inputs
    ptr_ref,                                   # SMEM (1,) int32  queue pointer
    xq_ref, xk_ref,                            # VMEM (B, DIN)    flattened inputs
    w1q_ref, b1q_ref, w2q_ref, b2q_ref,        # VMEM query-encoder params
    w1k_ref, b1k_ref, w2k_ref, b2k_ref,        # VMEM key-encoder params (pre-update)
    queue_ref,                                 # VMEM (K_QUEUE, FEAT)
    # outputs
    zq_ref, zk_ref,                            # VMEM (B, FEAT)
    queue_old_ref,                             # VMEM (K_QUEUE, FEAT) pre-enqueue clone
    w1k_new_ref, b1k_new_ref, w2k_new_ref, b2k_new_ref,   # updated key params
    new_queue_ref,                             # VMEM (K_QUEUE, FEAT)
    new_ptr_ref,                               # SMEM (1,) int32
    *, m,
):
    # ---- query encoder: Linear -> ReLU -> Linear (MXU, f32 accumulate) ----
    h_q = jnp.dot(xq_ref[...], w1q_ref[...], preferred_element_type=jnp.float32)
    h_q = jnp.maximum(h_q + b1q_ref[...], 0.0)
    z_q = jnp.dot(h_q, w2q_ref[...], preferred_element_type=jnp.float32) + b2q_ref[...]
    zq_ref[...] = z_q

    # ---- momentum update of the key encoder, fused with its use -----------
    # param_k = m * param_k + (1 - m) * param_q ; each weight read from HBM once,
    # updated in vregs, consumed by the MXU below, and written out as new param_k.
    w1k = w1k_ref[...] * m + w1q_ref[...] * (1.0 - m)
    b1k = b1k_ref[...] * m + b1q_ref[...] * (1.0 - m)
    w2k = w2k_ref[...] * m + w2q_ref[...] * (1.0 - m)
    b2k = b2k_ref[...] * m + b2q_ref[...] * (1.0 - m)
    w1k_new_ref[...] = w1k
    b1k_new_ref[...] = b1k
    w2k_new_ref[...] = w2k
    b2k_new_ref[...] = b2k

    # ---- key encoder on the freshly-updated params (still resident) -------
    # TODO(synk): _batch_shuffle_ddp / _batch_unshuffle_ddp / concat_all_gather need
    #             multi-device RDMA; single-device (non-distributed) path is a no-op.
    h_k = jnp.dot(xk_ref[...], w1k, preferred_element_type=jnp.float32)
    h_k = jnp.maximum(h_k + b1k, 0.0)
    z_k = jnp.dot(h_k, w2k, preferred_element_type=jnp.float32) + b2k
    zk_ref[...] = z_k

    # ---- pre-enqueue clone of the queue (internal (K, FEAT) layout) --------
    q_old = queue_ref[...]
    queue_old_ref[...] = q_old

    # ---- L2 normalize keys (rsqrt -> EUP) and enqueue ----------------------
    # F.normalize(z, p=2, dim=-1) == z / max(||z||, 1e-12); sqrt is monotone so
    # z * rsqrt(max(sum(z^2), 1e-24)) is exactly equivalent.
    sumsq = jnp.sum(z_k * z_k, axis=-1, keepdims=True)
    keys = z_k * jax.lax.rsqrt(jnp.maximum(sumsq, 1e-24))

    # queue stored (K, FEAT): writing B consecutive rows starting at ptr is
    # equivalent to queue[:, ptr:ptr+B] = keys.T in the (FEAT, K) PyTorch layout.
    new_queue_ref[...] = q_old
    p = ptr_ref[0]
    new_queue_ref[pl.ds(p, B), :] = keys
    new_ptr_ref[0] = (p + B) % K_QUEUE


# ---- Moco forward (one Pallas launch + jitted glue) ---------------------------
@jax.jit
def moco_forward(params_q, params_k, queue_kf, queue_ptr, x_q, x_k):
    # glue: flatten NCHW -> (B, C*H*W); everything else runs inside the kernel.
    xq = x_q.reshape(x_q.shape[0], -1).astype(jnp.float32)
    xk = x_k.reshape(x_k.shape[0], -1).astype(jnp.float32)

    out_shape = (
        jax.ShapeDtypeStruct((B, FEAT), jnp.float32),        # z_q
        jax.ShapeDtypeStruct((B, FEAT), jnp.float32),        # z_k
        jax.ShapeDtypeStruct((K_QUEUE, FEAT), jnp.float32),  # pre-enqueue queue clone
        jax.ShapeDtypeStruct((DIN, HID), jnp.float32),       # new w1_k
        jax.ShapeDtypeStruct((1, HID), jnp.float32),         # new b1_k
        jax.ShapeDtypeStruct((HID, FEAT), jnp.float32),      # new w2_k
        jax.ShapeDtypeStruct((1, FEAT), jnp.float32),        # new b2_k
        jax.ShapeDtypeStruct((K_QUEUE, FEAT), jnp.float32),  # new queue
        jax.ShapeDtypeStruct((1,), jnp.int32),               # new queue_ptr
    )
    in_specs = [pl.BlockSpec(memory_space=SMEM)] + [pl.BlockSpec(memory_space=VMEM)] * 11
    out_specs = (
        pl.BlockSpec(memory_space=VMEM),   # z_q
        pl.BlockSpec(memory_space=VMEM),   # z_k
        pl.BlockSpec(memory_space=VMEM),   # queue clone
        pl.BlockSpec(memory_space=VMEM),   # new w1_k
        pl.BlockSpec(memory_space=VMEM),   # new b1_k
        pl.BlockSpec(memory_space=VMEM),   # new w2_k
        pl.BlockSpec(memory_space=VMEM),   # new b2_k
        pl.BlockSpec(memory_space=VMEM),   # new queue
        pl.BlockSpec(memory_space=SMEM),   # new ptr
    )

    (z_q, z_k, queue_old_kf,
     w1k, b1k, w2k, b2k,
     new_queue_kf, new_ptr) = pl.pallas_call(
        functools.partial(_moco_fused_kernel, m=M_MOMENTUM),
        out_shape=out_shape,
        in_specs=in_specs,
        out_specs=out_specs,
    )(queue_ptr, xq, xk,
      params_q["w1"], params_q["b1"], params_q["w2"], params_q["b2"],
      params_k["w1"], params_k["b1"], params_k["w2"], params_k["b2"],
      queue_kf)

    new_params_k = {"w1": w1k, "b1": b1k, "w2": w2k, "b2": b2k}
    # Returned queue clone back in the PyTorch (FEAT, K) layout; this 2 KiB
    # layout op lives in the jitted wrapper (no extra dispatch beyond the one
    # XLA program) and keeps the Mosaic lowering free of in-kernel transposes.
    queue_old_fk = queue_old_kf.T
    return (z_q, z_k, queue_old_fk), (new_params_k, new_queue_kf, new_ptr)


def init_state(key):
    k1, k2, k3, k4, kq = jax.random.split(key, 5)
    params_q = {
        "w1": jax.random.normal(k1, (DIN, HID), jnp.float32) * 0.02,
        "b1": jax.random.normal(k2, (1, HID), jnp.float32) * 0.01,
        "w2": jax.random.normal(k3, (HID, FEAT), jnp.float32) * 0.02,
        "b2": jax.random.normal(k4, (1, FEAT), jnp.float32) * 0.01,
    }
    # encoder_k initialised as a copy of encoder_q (requires_grad=False is moot here)
    params_k = {n: v for n, v in params_q.items()}
    # queue = normalize(randn(feature_dim, K), dim=0); stored internally as (K, FEAT)
    q_fk = jax.random.normal(kq, (FEAT, K_QUEUE), jnp.float32)
    q_fk = q_fk / jnp.maximum(jnp.sqrt(jnp.sum(q_fk * q_fk, axis=0, keepdims=True)), 1e-12)
    queue_kf = q_fk.T
    queue_ptr = jnp.zeros((1,), jnp.int32)
    return params_q, params_k, queue_kf, queue_ptr


if __name__ == "__main__":
    key = jax.random.PRNGKey(0)
    kx1, kx2, kp = jax.random.split(key, 3)
    x_q = jax.random.normal(kx1, (B, C, H, W), jnp.float32)
    x_k = jax.random.normal(kx2, (B, C, H, W), jnp.float32)

    params_q, params_k, queue_kf, queue_ptr = init_state(kp)

    (z_q, z_k, queue_old), (new_params_k, new_queue_kf, new_ptr) = moco_forward(
        params_q, params_k, queue_kf, queue_ptr, x_q, x_k
    )
    jax.block_until_ready((z_q, z_k, queue_old, new_queue_kf, new_ptr))

    # --- light correctness check against a plain-JAX reference ---
    def ref_encoder(p, x):
        xf = x.reshape(x.shape[0], -1)
        h = jnp.maximum(xf @ p["w1"] + p["b1"], 0.0)
        return h @ p["w2"] + p["b2"]

    ref_pk = {n: params_k[n] * M_MOMENTUM + params_q[n] * (1.0 - M_MOMENTUM) for n in params_q}
    ref_zq = ref_encoder(params_q, x_q)
    ref_zk = ref_encoder(ref_pk, x_k)
    ref_keys = ref_zk / jnp.maximum(
        jnp.sqrt(jnp.sum(ref_zk * ref_zk, axis=-1, keepdims=True)), 1e-12
    )
    ref_newq = queue_kf.at[0:B, :].set(ref_keys)  # ptr starts at 0

    assert jnp.allclose(z_q, ref_zq, atol=1e-4), "z_q mismatch"
    assert jnp.allclose(z_k, ref_zk, atol=1e-4), "z_k mismatch"
    assert jnp.allclose(queue_old, queue_kf.T, atol=1e-6), "queue clone mismatch"
    assert jnp.allclose(new_queue_kf, ref_newq, atol=1e-4), "enqueue mismatch"
    for n in params_q:
        assert jnp.allclose(new_params_k[n], ref_pk[n], atol=1e-6), f"momentum {n} mismatch"
    assert int(new_ptr[0]) == (0 + B) % K_QUEUE, "ptr mismatch"

    print("KERNEL_OK")
</pallas_src>

<mosaic_0001>
module attributes {stable_mosaic.version = 11 : i64} {
  func.func @_moco_fused_kernel(%arg0: memref<1xi32, #tpu.memory_space<smem>>, %arg1: memref<2x1024xf32, #tpu.memory_space<vmem>>, %arg2: memref<2x1024xf32, #tpu.memory_space<vmem>>, %arg3: memref<1024x32xf32, #tpu.memory_space<vmem>>, %arg4: memref<1x32xf32, #tpu.memory_space<vmem>>, %arg5: memref<32x8xf32, #tpu.memory_space<vmem>>, %arg6: memref<1x8xf32, #tpu.memory_space<vmem>>, %arg7: memref<1024x32xf32, #tpu.memory_space<vmem>>, %arg8: memref<1x32xf32, #tpu.memory_space<vmem>>, %arg9: memref<32x8xf32, #tpu.memory_space<vmem>>, %arg10: memref<1x8xf32, #tpu.memory_space<vmem>>, %arg11: memref<64x8xf32, #tpu.memory_space<vmem>>, %arg12: memref<2x8xf32, #tpu.memory_space<vmem>>, %arg13: memref<2x8xf32, #tpu.memory_space<vmem>>, %arg14: memref<64x8xf32, #tpu.memory_space<vmem>>, %arg15: memref<1024x32xf32, #tpu.memory_space<vmem>>, %arg16: memref<1x32xf32, #tpu.memory_space<vmem>>, %arg17: memref<32x8xf32, #tpu.memory_space<vmem>>, %arg18: memref<1x8xf32, #tpu.memory_space<vmem>>, %arg19: memref<64x8xf32, #tpu.memory_space<vmem>>, %arg20: memref<1xi32, #tpu.memory_space<smem>>) attributes {dimension_semantics = [], scalar_prefetch = 0 : i64, scratch_operands = 0 : i64, tpu.core_type = #tpu.core_type<tc>} {
    %c0 = arith.constant 0 : index
    %c0_0 = arith.constant 0 : index
    %0 = vector.load %arg1[%c0, %c0_0] : memref<2x1024xf32, #tpu.memory_space<vmem>>, vector<2x1024xf32>
    %c0_1 = arith.constant 0 : index
    %c0_2 = arith.constant 0 : index
    %1 = vector.load %arg3[%c0_1, %c0_2] : memref<1024x32xf32, #tpu.memory_space<vmem>>, vector<1024x32xf32>
    %cst = arith.constant dense<0.000000e+00> : vector<2x32xf32>
    %2 = tpu.matmul %0, %1, %cst {dimension_numbers = #tpu.dot_dimension_numbers<[1], [0], [0], [1], [0, 0, 1, 1], [], []>} : vector<2x1024xf32>, vector<1024x32xf32>, vector<2x32xf32> -> vector<2x32xf32>
    %c0_3 = arith.constant 0 : index
    %c0_4 = arith.constant 0 : index
    %3 = vector.load %arg4[%c0_3, %c0_4] : memref<1x32xf32, #tpu.memory_space<vmem>>, vector<1x32xf32>
    %4 = vector.broadcast %3 : vector<1x32xf32> to vector<2x32xf32>
    %5 = arith.addf %2, %4 : vector<2x32xf32>
    %cst_5 = arith.constant 0.000000e+00 : f32
    %6 = vector.broadcast %cst_5 : f32 to vector<2x32xf32>
    %7 = arith.maximumf %5, %6 : vector<2x32xf32>
    %c0_6 = arith.constant 0 : index
    %c0_7 = arith.constant 0 : index
    %8 = vector.load %arg5[%c0_6, %c0_7] : memref<32x8xf32, #tpu.memory_space<vmem>>, vector<32x8xf32>
    %cst_8 = arith.constant dense<0.000000e+00> : vector<2x8xf32>
    %9 = tpu.matmul %7, %8, %cst_8 {dimension_numbers = #tpu.dot_dimension_numbers<[1], [0], [0], [1], [0, 0, 1, 1], [], []>} : vector<2x32xf32>, vector<32x8xf32>, vector<2x8xf32> -> vector<2x8xf32>
    %c0_9 = arith.constant 0 : index
    %c0_10 = arith.constant 0 : index
    %10 = vector.load %arg6[%c0_9, %c0_10] : memref<1x8xf32, #tpu.memory_space<vmem>>, vector<1x8xf32>
    %11 = vector.broadcast %10 : vector<1x8xf32> to vector<2x8xf32>
    %12 = arith.addf %9, %11 : vector<2x8xf32>
    %c0_11 = arith.constant 0 : index
    %c0_12 = arith.constant 0 : index
    %13 = vector.load %arg12[%c0_11, %c0_12] : memref<2x8xf32, #tpu.memory_space<vmem>>, vector<2x8xf32>
    tpu.vector_store %arg12[%c0_11, %c0_12], %12 {strides = array<i32>} : memref<2x8xf32, #tpu.memory_space<vmem>>, vector<2x8xf32>,
    %c0_13 = arith.constant 0 : index
    %c0_14 = arith.constant 0 : index
    %14 = vector.load %arg7[%c0_13, %c0_14] : memref<1024x32xf32, #tpu.memory_space<vmem>>, vector<1024x32xf32>
    %cst_15 = arith.constant 9.990000e-01 : f32
    %15 = vector.broadcast %cst_15 : f32 to vector<1024x32xf32>
    %16 = arith.mulf %14, %15 : vector<1024x32xf32>
    %c0_16 = arith.constant 0 : index
    %c0_17 = arith.constant 0 : index
    %17 = vector.load %arg3[%c0_16, %c0_17] : memref<1024x32xf32, #tpu.memory_space<vmem>>, vector<1024x32xf32>
    %cst_18 = arith.constant 1.000000e-03 : f32
    %18 = vector.broadcast %cst_18 : f32 to vector<1024x32xf32>
    %19 = arith.mulf %17, %18 : vector<1024x32xf32>
    %20 = arith.addf %16, %19 : vector<1024x32xf32>
    %c0_19 = arith.constant 0 : index
    %c0_20 = arith.constant 0 : index
    %21 = vector.load %arg8[%c0_19, %c0_20] : memref<1x32xf32, #tpu.memory_space<vmem>>, vector<1x32xf32>
    %cst_21 = arith.constant 9.990000e-01 : f32
    %22 = vector.broadcast %cst_21 : f32 to vector<1x32xf32>
    %23 = arith.mulf %21, %22 : vector<1x32xf32>
    %c0_22 = arith.constant 0 : index
    %c0_23 = arith.constant 0 : index
    %24 = vector.load %arg4[%c0_22, %c0_23] : memref<1x32xf32, #tpu.memory_space<vmem>>, vector<1x32xf32>
    %cst_24 = arith.constant 1.000000e-03 : f32
    %25 = vector.broadcast %cst_24 : f32 to vector<1x32xf32>
    %26 = arith.mulf %24, %25 : vector<1x32xf32>
    %27 = arith.addf %23, %26 : vector<1x32xf32>
    %c0_25 = arith.constant 0 : index
    %c0_26 = arith.constant 0 : index
    %28 = vector.load %arg9[%c0_25, %c0_26] : memref<32x8xf32, #tpu.memory_space<vmem>>, vector<32x8xf32>
    %cst_27 = arith.constant 9.990000e-01 : f32
    %29 = vector.broadcast %cst_27 : f32 to vector<32x8xf32>
    %30 = arith.mulf %28, %29 : vector<32x8xf32>
    %c0_28 = arith.constant 0 : index
    %c0_29 = arith.constant 0 : index
    %31 = vector.load %arg5[%c0_28, %c0_29] : memref<32x8xf32, #tpu.memory_space<vmem>>, vector<32x8xf32>
    %cst_30 = arith.constant 1.000000e-03 : f32
    %32 = vector.broadcast %cst_30 : f32 to vector<32x8xf32>
    %33 = arith.mulf %31, %32 : vector<32x8xf32>
    %34 = arith.addf %30, %33 : vector<32x8xf32>
    %c0_31 = arith.constant 0 : index
    %c0_32 = arith.constant 0 : index
    %35 = vector.load %arg10[%c0_31, %c0_32] : memref<1x8xf32, #tpu.memory_space<vmem>>, vector<1x8xf32>
    %cst_33 = arith.constant 9.990000e-01 : f32
    %36 = vector.broadcast %cst_33 : f32 to vector<1x8xf32>
    %37 = arith.mulf %35, %36 : vector<1x8xf32>
    %c0_34 = arith.constant 0 : index
    %c0_35 = arith.constant 0 : index
    %38 = vector.load %arg6[%c0_34, %c0_35] : memref<1x8xf32, #tpu.memory_space<vmem>>, vector<1x8xf32>
    %cst_36 = arith.constant 1.000000e-03 : f32
    %39 = vector.broadcast %cst_36 : f32 to vector<1x8xf32>
    %40 = arith.mulf %38, %39 : vector<1x8xf32>
    %41 = arith.addf %37, %40 : vector<1x8xf32>
    %c0_37 = arith.constant 0 : index
    %c0_38 = arith.constant 0 : index
    %42 = vector.load %arg15[%c0_37, %c0_38] : memref<1024x32xf32, #tpu.memory_space<vmem>>, vector<1024x32xf32>
    tpu.vector_store %arg15[%c0_37, %c0_38], %20 {strides = array<i32>} : memref<1024x32xf32, #tpu.memory_space<vmem>>, vector<1024x32xf32>,
    %c0_39 = arith.constant 0 : index
    %c0_40 = arith.constant 0 : index
    %43 = vector.load %arg16[%c0_39, %c0_40] : memref<1x32xf32, #tpu.memory_space<vmem>>, vector<1x32xf32>
    tpu.vector_store %arg16[%c0_39, %c0_40], %27 {strides = array<i32>} : memref<1x32xf32, #tpu.memory_space<vmem>>, vector<1x32xf32>,
    %c0_41 = arith.constant 0 : index
    %c0_42 = arith.constant 0 : index
    %44 = vector.load %arg17[%c0_41, %c0_42] : memref<32x8xf32, #tpu.memory_space<vmem>>, vector<32x8xf32>
    tpu.vector_store %arg17[%c0_41, %c0_42], %34 {strides = array<i32>} : memref<32x8xf32, #tpu.memory_space<vmem>>, vector<32x8xf32>,
    %c0_43 = arith.constant 0 : index
    %c0_44 = arith.constant 0 : index
    %45 = vector.load %arg18[%c0_43, %c0_44] : memref<1x8xf32, #tpu.memory_space<vmem>>, vector<1x8xf32>
    tpu.vector_store %arg18[%c0_43, %c0_44], %41 {strides = array<i32>} : memref<1x8xf32, #tpu.memory_space<vmem>>, vector<1x8xf32>,
    %c0_45 = arith.constant 0 : index
    %c0_46 = arith.constant 0 : index
    %46 = vector.load %arg2[%c0_45, %c0_46] : memref<2x1024xf32, #tpu.memory_space<vmem>>, vector<2x1024xf32>
    %cst_47 = arith.constant dense<0.000000e+00> : vector<2x32xf32>
    %47 = tpu.matmul %46, %20, %cst_47 {dimension_numbers = #tpu.dot_dimension_numbers<[1], [0], [0], [1], [0, 0, 1, 1], [], []>} : vector<2x1024xf32>, vector<1024x32xf32>, vector<2x32xf32> -> vector<2x32xf32>
    %48 = vector.broadcast %27 : vector<1x32xf32> to vector<2x32xf32>
    %49 = arith.addf %47, %48 : vector<2x32xf32>
    %cst_48 = arith.constant 0.000000e+00 : f32
    %50 = vector.broadcast %cst_48 : f32 to vector<2x32xf32>
    %51 = arith.maximumf %49, %50 : vector<2x32xf32>
    %cst_49 = arith.constant dense<0.000000e+00> : vector<2x8xf32>
    %52 = tpu.matmul %51, %34, %cst_49 {dimension_numbers = #tpu.dot_dimension_numbers<[1], [0], [0], [1], [0, 0, 1, 1], [], []>} : vector<2x32xf32>, vector<32x8xf32>, vector<2x8xf32> -> vector<2x8xf32>
    %53 = vector.broadcast %41 : vector<1x8xf32> to vector<2x8xf32>
    %54 = arith.addf %52, %53 : vector<2x8xf32>
    %c0_50 = arith.constant 0 : index
    %c0_51 = arith.constant 0 : index
    %55 = vector.load %arg13[%c0_50, %c0_51] : memref<2x8xf32, #tpu.memory_space<vmem>>, vector<2x8xf32>
    tpu.vector_store %arg13[%c0_50, %c0_51], %54 {strides = array<i32>} : memref<2x8xf32, #tpu.memory_space<vmem>>, vector<2x8xf32>,
    %c0_52 = arith.constant 0 : index
    %c0_53 = arith.constant 0 : index
    %56 = vector.load %arg11[%c0_52, %c0_53] : memref<64x8xf32, #tpu.memory_space<vmem>>, vector<64x8xf32>
    %c0_54 = arith.constant 0 : index
    %c0_55 = arith.constant 0 : index
    %57 = vector.load %arg14[%c0_54, %c0_55] : memref<64x8xf32, #tpu.memory_space<vmem>>, vector<64x8xf32>
    tpu.vector_store %arg14[%c0_54, %c0_55], %56 {strides = array<i32>} : memref<64x8xf32, #tpu.memory_space<vmem>>, vector<64x8xf32>,
    %58 = arith.mulf %54, %54 : vector<2x8xf32>
    %cst_56 = arith.constant dense<0.000000e+00> : vector<2xf32>
    %59 = vector.multi_reduction <add>, %58, %cst_56 [1] : vector<2x8xf32> to vector<2xf32>
    %60 = vector.shape_cast %59 : vector<2xf32> to vector<2x1xf32>
    %cst_57 = arith.constant 1.000000e-24 : f32
    %61 = vector.broadcast %cst_57 : f32 to vector<2x1xf32>
    %62 = arith.maximumf %60, %61 : vector<2x1xf32>
    %63 = math.rsqrt %62 : vector<2x1xf32>
    %64 = vector.broadcast %63 : vector<2x1xf32> to vector<2x8xf32>
    %65 = arith.mulf %54, %64 : vector<2x8xf32>
    %c0_58 = arith.constant 0 : index
    %c0_59 = arith.constant 0 : index
    %66 = vector.load %arg19[%c0_58, %c0_59] : memref<64x8xf32, #tpu.memory_space<vmem>>, vector<64x8xf32>
    tpu.vector_store %arg19[%c0_58, %c0_59], %56 {strides = array<i32>} : memref<64x8xf32, #tpu.memory_space<vmem>>, vector<64x8xf32>,
    %c0_60 = arith.constant 0 : index
    %67 = memref.load %arg0[%c0_60] : memref<1xi32, #tpu.memory_space<smem>>
    %68 = arith.index_cast %67 : i32 to index
    %c0_61 = arith.constant 0 : index
    %69 = vector.load %arg19[%68, %c0_61] : memref<64x8xf32, #tpu.memory_space<vmem>>, vector<2x8xf32>
    tpu.vector_store %arg19[%68, %c0_61], %65 {strides = array<i32>} : memref<64x8xf32, #tpu.memory_space<vmem>>, vector<2x8xf32>,
    %c2_i32 = arith.constant 2 : i32
    %70 = arith.addi %67, %c2_i32 : i32
    %c64_i32 = arith.constant 64 : i32
    %c0_i32 = arith.constant 0 : i32
    %71 = arith.cmpi eq, %c64_i32, %c0_i32 : i32
    %c1_i32 = arith.constant 1 : i32
    %72 = arith.select %71, %c1_i32, %c64_i32 : i32
    %73 = arith.remsi %70, %72 : i32
    %c0_i32_62 = arith.constant 0 : i32
    %74 = arith.cmpi ne, %73, %c0_i32_62 : i32
    %c0_i32_63 = arith.constant 0 : i32
    %75 = arith.cmpi slt, %73, %c0_i32_63 : i32
    %c0_i32_64 = arith.constant 0 : i32
    %76 = arith.cmpi slt, %72, %c0_i32_64 : i32
    %77 = arith.xori %75, %76 : i1
    %78 = arith.andi %77, %74 : i1
    %79 = arith.addi %73, %72 : i32
    %80 = arith.select %78, %79, %73 : i32
    %c0_65 = arith.constant 0 : index
    %81 = memref.load %arg20[%c0_65] : memref<1xi32, #tpu.memory_space<smem>>
    memref.store %80, %arg20[%c0_65] : memref<1xi32, #tpu.memory_space<smem>>
    return
  }
}

</mosaic_0001>

<bundles_post_ra>
// kernel: moco_forward.1
= control target key start
LH: loop header
LB: loop body
LE: loop exit
PB: predicated region body
PF: predicated region fallthrough
CT: control target
= control target key end

     0   :  { %s5102_s0 = inlined_call_operand.<no memory space> [shape: s32[1], index: 0, kind: input, shape index: {}]   ;;  %s5103_s1 = inlined_call_operand.vmem [shape: f32[2,1024], index: 1, kind: input, shape index: {}]   ;;  %s5104_s2 = inlined_call_operand.vmem [shape: f32[2,1024], index: 2, kind: input, shape index: {}]   ;;  %s5105_s3 = inlined_call_operand.vmem [shape: f32[1024,32], index: 3, kind: input, shape index: {}]   ;;  %s5106_s4 = inlined_call_operand.vmem [shape: f32[1,32], index: 4, kind: input, shape index: {}]   ;;  %s5107_s5 = inlined_call_operand.vmem [shape: f32[32,8], index: 5, kind: input, shape index: {}]   ;;  %s5108_s6 = inlined_call_operand.vmem [shape: f32[1,8], index: 6, kind: input, shape index: {}]   ;;  %s5109_s7 = inlined_call_operand.vmem [shape: f32[1024,32], index: 7, kind: input, shape index: {}]   ;;  %s5110_s8 = inlined_call_operand.vmem [shape: f32[1,32], index: 8, kind: input, shape index: {}]   ;;  %s5111_s9 = inlined_call_operand.vmem [shape: f32[32,8], index: 9, kind: input, shape index: {}]   ;;  %s5112_s10 = inlined_call_operand.vmem [shape: f32[1,8], index: 10, kind: input, shape index: {}]   ;;  %s5113_s11 = inlined_call_operand.vmem [shape: f32[64,8], index: 11, kind: input, shape index: {}]   ;;  %s5114_s12 = inlined_call_operand.hbm [shape: f32[2,8], index: 12, kind: output, shape index: {0}]   ;;  %s5115_s13 = inlined_call_operand.hbm [shape: f32[2,8], index: 13, kind: output, shape index: {1}]   ;;  %s5116_s14 = inlined_call_operand.vmem [shape: f32[64,8], index: 14, kind: output, shape index: {2}]   ;;  %s5117_s15 = inlined_call_operand.vmem [shape: f32[1024,32], index: 15, kind: output, shape index: {3}]   ;;  %s5118_s16 = inlined_call_operand.hbm [shape: f32[1,32], index: 16, kind: output, shape index: {4}]   ;;  %s5119_s17 = inlined_call_operand.vmem [shape: f32[32,8], index: 17, kind: output, shape index: {5}]   ;;  %s5120_s18 = inlined_call_operand.hbm [shape: f32[1,8], index: 18, kind: output, shape index: {6}]   ;;  %s5121_s19 = inlined_call_operand.vmem [shape: f32[64,8], index: 19, kind: output, shape index: {7}]   ;;  %s5122_s20 = inlined_call_operand.hbm [shape: s32[1], index: 20, kind: output, shape index: {8}]  }
   0x1   :  { %5143 = sst [smem:[#allocation30_spill]] %s5102_s0 }
   0x2   :  { %5144 = sst [smem:[#allocation31_spill]] %s5103_s1 }
   0x3   :  { %5145 = sst [smem:[#allocation32_spill]] %s5104_s2 }
   0x4   :  { %5146 = sst [smem:[#allocation33_spill]] %s5105_s3 }
   0x5   :  { %5147 = sst [smem:[#allocation34_spill]] %s5106_s4 }
   0x6   :  { %27 = vsyncpa [#allocation4], 0 }
   0x7   :  { %28 = vsyncpa [#allocation7], 0 }
   0x8   :  { %29 = vsyncpa [#allocation10], 0  ;;  %s5148_s23 = sld [smem:[#allocation33_spill]]  ;;  %v2666_v47 = vmov 1983009808   ;;  %v198_v49 = vlaneseq  ;;  %s5150_s1 = sld [smem:[#allocation31_spill]] }
   0x9   :  { %v196_v48 = vunpack.c.l.s4 %v2666_v47 }
   0xb   :  { %v197_v63 = vunpack.c.0.s8 %v196_v48 }
   0xe   :  { %v2783_v0 = vld [vmem:[%s5148_s23 + $0x80] sm:$0xff]  ;;  %v2788_v1 = vld [vmem:[%s5148_s23 + $0x88] sm:$0xff]  ;;  %v2819_v11 = vld [vmem:[%s5148_s23 + $0x90] sm:$0xff] }
   0xf   :  { %v2793_v2 = vld [vmem:[%s5148_s23] sm:$0xff]  ;;  %v2277_v3 = vpack.c.bf16 %v2788_v1, %v2783_v0  ;;  %v2800_v4 = vld [vmem:[%s5148_s23 + $0x8] sm:$0xff]  ;;  %v2824_v13 = vld [vmem:[%s5148_s23 + $0x98] sm:$0xff] }
  0x10   :  { %v105_v5 = vld [vmem:[%s5148_s23 + $0x180] sm:$0xff]  ;;  %v106_v6 = vld [vmem:[%s5148_s23 + $0x188] sm:$0xff]  ;;  %v2279_v7 = vpack.c.bf16 %v2800_v4, %v2793_v2  ;;  %v2829_v14 = vld [vmem:[%s5148_s23 + $0x10] sm:$0xff]  ;;  %v2281_v16 = vpack.c.bf16 %v2824_v13, %v2819_v11 }
  0x11   :  { %v2309_v8 = vpack.c.bf16 %v106_v6, %v105_v5  ;;  %v89_v9 = vld [vmem:[%s5148_s23 + $0x100] sm:$0xff]  ;;  %v90_v10 = vld [vmem:[%s5148_s23 + $0x108] sm:$0xff]  ;;  %2278 = vmatprep.subr.bf16.mxu0 %v2277_v3  ;;  %v2834_v15 = vld [vmem:[%s5148_s23 + $0x18] sm:$0xff]  ;;  %v2968_v3 = vshrl.u32 %v198_v49, 7 }
  0x12   :  { %v2311_v12 = vpack.c.bf16 %v90_v10, %v89_v9  ;;  %2280 = vmatpush3.bf16.msra.mxu0 %v2279_v7  ;;  %v2283_v17 = vpack.c.bf16 %v2834_v15, %v2829_v14  ;;  %v107_v18 = vld [vmem:[%s5148_s23 + $0x190] sm:$0xff]  ;;  %v108_v19 = vld [vmem:[%s5148_s23 + $0x198] sm:$0xff]  ;;  %v2855_v23 = vld [vmem:[%s5148_s23 + $0xa0] sm:$0xff] }
  0x13   :  { %2310 = vmatprep.subr.bf16.mxu1 %v2309_v8  ;;  %v91_v20 = vld [vmem:[%s5148_s23 + $0x110] sm:$0xff]  ;;  %v2313_v21 = vpack.c.bf16 %v108_v19, %v107_v18  ;;  %v92_v22 = vld [vmem:[%s5148_s23 + $0x118] sm:$0xff]  ;;  %v2860_v24 = vld [vmem:[%s5148_s23 + $0xa8] sm:$0xff]  ;;  %2282 = vmatprep.subr.bf16.mxu0 %v2281_v16  ;;  %5149 = vst [vmem:[#allocation16_spill] sm:$0xff] %v2968_v3 }
  0x14   :  { %2312 = vmatpush3.bf16.msra.mxu1 %v2311_v12  ;;  %v2315_v25 = vpack.c.bf16 %v92_v22, %v91_v20  ;;  %v2285_v26 = vpack.c.bf16 %v2860_v24, %v2855_v23  ;;  %v2867_v27 = vld [vmem:[%s5148_s23 + $0x20] sm:$0xff]  ;;  %v2872_v28 = vld [vmem:[%s5148_s23 + $0x28] sm:$0xff]  ;;  %v2891_v35 = vld [vmem:[%s5148_s23 + $0xb0] sm:$0xff] }
  0x15   :  { %v109_v29 = vld [vmem:[%s5148_s23 + $0x1a0] sm:$0xff]  ;;  %2314 = vmatprep.subr.bf16.mxu1 %v2313_v21  ;;  %v110_v30 = vld [vmem:[%s5148_s23 + $0x1a8] sm:$0xff]  ;;  %v2287_v33 = vpack.c.bf16 %v2872_v28, %v2867_v27  ;;  %v2896_v36 = vld [vmem:[%s5148_s23 + $0xb8] sm:$0xff]  ;;  %v3007_v21 = vsub.s32 %v197_v63, %v2968_v3 }
  0x16   :  { %v93_v31 = vld [vmem:[%s5148_s23 + $0x120] sm:$0xff]  ;;  %v94_v32 = vld [vmem:[%s5148_s23 + $0x128] sm:$0xff]  ;;  %2284 = vmatpush3.bf16.msra.mxu0 %v2283_v17  ;;  %v2317_v34 = vpack.c.bf16 %v110_v30, %v109_v29  ;;  %v2901_v37 = vld [vmem:[%s5148_s23 + $0x30] sm:$0xff]  ;;  %v2289_v39 = vpack.c.bf16 %v2896_v36, %v2891_v35 }
  0x17   :  { %2286 = vmatprep.subr.bf16.mxu0 %v2285_v26  ;;  %v2319_v38 = vpack.c.bf16 %v94_v32, %v93_v31  ;;  %v2908_v40 = vld [vmem:[%s5148_s23 + $0x38] sm:$0xff]  ;;  %v111_v41 = vld [vmem:[%s5148_s23 + $0x1b0] sm:$0xff]  ;;  %v2925_v46 = vld [vmem:[%s5148_s23 + $0xc0] sm:$0xff] }
  0x18   :  { %2316 = vmatpush3.bf16.msra.mxu1 %v2315_v25  ;;  %v112_v42 = vld [vmem:[%s5148_s23 + $0x1b8] sm:$0xff]  ;;  %v95_v44 = vld [vmem:[%s5148_s23 + $0x130] sm:$0xff]  ;;  %v2930_v50 = vld [vmem:[%s5148_s23 + $0xc8] sm:$0xff]  ;;  %v2291_v51 = vpack.c.bf16 %v2908_v40, %v2901_v37 }
  0x19   :  { %2318 = vmatprep.subr.bf16.mxu1 %v2317_v34  ;;  %v2321_v43 = vpack.c.bf16 %v112_v42, %v111_v41  ;;  %v96_v45 = vld [vmem:[%s5148_s23 + $0x138] sm:$0xff]  ;;  %v113_v52 = vld [vmem:[%s5148_s23 + $0x1c0] sm:$0xff]  ;;  %v114_v53 = vld [vmem:[%s5148_s23 + $0x1c8] sm:$0xff]  ;;  %v2293_v55 = vpack.c.bf16 %v2930_v50, %v2925_v46 }
  0x1a   :  { %2288 = vmatpush3.bf16.msra.mxu0 %v2287_v33  ;;  %v2323_v54 = vpack.c.bf16 %v96_v45, %v95_v44  ;;  %v2945_v56 = vld [vmem:[%s5148_s23 + $0x40] sm:$0xff]  ;;  %v2950_v57 = vld [vmem:[%s5148_s23 + $0x48] sm:$0xff]  ;;  %v2325_v59 = vpack.c.bf16 %v114_v53, %v113_v52  ;;  %v2961_v61 = vld [vmem:[%s5148_s23 + $0xd0] sm:$0xff] }
  0x1b   :  { %2290 = vmatprep.subr.bf16.mxu0 %v2289_v39  ;;  %v97_v58 = vld [vmem:[%s5148_s23 + $0x140] sm:$0xff]  ;;  %v98_v60 = vld [vmem:[%s5148_s23 + $0x148] sm:$0xff]  ;;  %v2966_v62 = vld [vmem:[%s5148_s23 + $0xd8] sm:$0xff]  ;;  %v2295_v7 = vpack.c.bf16 %v2950_v57, %v2945_v56 }
  0x1c   :  { %2320 = vmatpush3.bf16.msra.mxu1 %v2319_v38  ;;  %v115_v5 = vld [vmem:[%s5148_s23 + $0x1d0] sm:$0xff]  ;;  %v116_v6 = vld [vmem:[%s5148_s23 + $0x1d8] sm:$0xff]  ;;  %v2327_v8 = vpack.c.bf16 %v98_v60, %v97_v58  ;;  %v2297_v9 = vpack.c.bf16 %v2966_v62, %v2961_v61  ;;  %v2999_v19 = vld [vmem:[%s5148_s23 + $0xe0] sm:$0xff] }
  0x1d   :  { %2322 = vmatprep.subr.bf16.mxu1 %v2321_v43  ;;  %v2983_v10 = vld [vmem:[%s5148_s23 + $0x50] sm:$0xff]  ;;  %v2988_v12 = vld [vmem:[%s5148_s23 + $0x58] sm:$0xff]  ;;  %v2329_v17 = vpack.c.bf16 %v116_v6, %v115_v5  ;;  %v3004_v20 = vld [vmem:[%s5148_s23 + $0xe8] sm:$0xff] }
  0x1e   :  { %2292 = vmatpush3.bf16.msra.mxu0 %v2291_v51  ;;  %v99_v16 = vld [vmem:[%s5148_s23 + $0x150] sm:$0xff]  ;;  %v100_v18 = vld [vmem:[%s5148_s23 + $0x158] sm:$0xff]  ;;  %v117_v22 = vld [vmem:[%s5148_s23 + $0x1e0] sm:$0xff]  ;;  %v2299_v26 = vpack.c.bf16 %v2988_v12, %v2983_v10  ;;  %v2301_v31 = vpack.c.bf16 %v3004_v20, %v2999_v19 }
  0x1f   :  { %2294 = vmatprep.subr.bf16.mxu0 %v2293_v55  ;;  %v118_v25 = vld [vmem:[%s5148_s23 + $0x1e8] sm:$0xff]  ;;  %v3020_v29 = vld [vmem:[%s5148_s23 + $0x60] sm:$0xff]  ;;  %v2331_v30 = vpack.c.bf16 %v100_v18, %v99_v16  ;;  %v3041_v41 = vld [vmem:[%s5148_s23 + $0xf0] sm:$0xff] }
  0x20   :  { %2324 = vmatpush3.bf16.msra.mxu1 %v2323_v54  ;;  %v3027_v32 = vld [vmem:[%s5148_s23 + $0x68] sm:$0xff]  ;;  %v101_v33 = vld [vmem:[%s5148_s23 + $0x160] sm:$0xff]  ;;  %v2333_v38 = vpack.c.bf16 %v118_v25, %v117_v22  ;;  %v3046_v42 = vld [vmem:[%s5148_s23 + $0xf8] sm:$0xff] }
  0x21   :  { %2326 = vmatprep.subr.bf16.mxu1 %v2325_v59  ;;  %v55_v34 = vld [vmem:[%s5150_s1] sm:$0xff]  ;;  %v102_v39 = vld [vmem:[%s5148_s23 + $0x168] sm:$0xff]  ;;  %v119_v45 = vld [vmem:[%s5148_s23 + $0x1f0] sm:$0xff]  ;;  %v2303_v48 = vpack.c.bf16 %v3027_v32, %v3020_v29  ;;  %v2305_v53 = vpack.c.bf16 %v3046_v42, %v3041_v41 }
  0x22   :  { %2296 = vmatpush3.bf16.msra.mxu0 %v2295_v7  ;;  %v201_v43 = vrot.slane %v55_v34, %v3007_v21  ;;  %v194_v44 = vcombine.high %v55_v34, %v55_v34  ;;  %v120_v47 = vld [vmem:[%s5148_s23 + $0x1f8] sm:$0xff]  ;;  %v2335_v52 = vpack.c.bf16 %v102_v39, %v101_v33  ;;  %v3063_v54 = vld [vmem:[%s5148_s23 + $0x70] sm:$0xff]  ;;  %v3079_v63 = vld [vmem:[%s5148_s23 + $0x280] sm:$0xff] }
  0x23   :  { %2298 = vmatprep.subr.bf16.mxu0 %v2297_v9  ;;  %v3068_v55 = vld [vmem:[%s5148_s23 + $0x78] sm:$0xff]  ;;  %v103_v58 = vld [vmem:[%s5148_s23 + $0x170] sm:$0xff]  ;;  %v2337_v59 = vpack.c.bf16 %v120_v47, %v119_v45  ;;  %v3084_v5 = vld [vmem:[%s5148_s23 + $0x288] sm:$0xff] }
  0x24   :  { %2328 = vmatpush3.bf16.msra.mxu1 %v2327_v8  ;;  %v209_v49 = vcombine.high %v201_v43, %v201_v43  ;;  %v208_v51 = vrot.slane %v194_v44, %v3007_v21  ;;  %v104_v60 = vld [vmem:[%s5148_s23 + $0x178] sm:$0xff]  ;;  %v169_v7 = vld [vmem:[%s5148_s23 + $0x380] sm:$0xff]  ;;  %v170_v8 = vld [vmem:[%s5148_s23 + $0x388] sm:$0xff]  ;;  %v2307_v9 = vpack.c.bf16 %v3068_v55, %v3063_v54 }
  0x25   :  { %2330 = vmatprep.subr.bf16.mxu1 %v2329_v17  ;;  %v2339_v16 = vpack.c.bf16 %v104_v60, %v103_v58  ;;  %v2341_v17 = vpack.c.bf16 %v3084_v5, %v3079_v63  ;;  %v3099_v18 = vld [vmem:[%s5148_s23 + $0x200] sm:$0xff]  ;;  %v3104_v22 = vld [vmem:[%s5148_s23 + $0x208] sm:$0xff]  ;;  %v3120_v33 = vld [vmem:[%s5148_s23 + $0x298] sm:$0xff] }
  0x26   :  { %2300 = vmatpush3.bf16.msra.mxu0 %v2299_v26  ;;  %300 = vmatprep.mubr.f32.mxu0 %v209_v49  ;;  %v210_v6 = vcombine.high %v208_v51, %v208_v51  ;;  %v153_v25 = vld [vmem:[%s5148_s23 + $0x300] sm:$0xff]  ;;  %v2373_v26 = vpack.c.bf16 %v170_v8, %v169_v7  ;;  %v171_v34 = vld [vmem:[%s5148_s23 + $0x390] sm:$0xff]  ;;  %v2343_v39 = vpack.c.bf16 %v3104_v22, %v3099_v18 }
  0x27   :  { %2302 = vmatprep.subr.bf16.mxu0 %v2301_v31  ;;  %v3115_v31 = vld [vmem:[%s5148_s23 + $0x290] sm:$0xff]  ;;  %v141_v58 = vld [vmem:[%s5148_s23 + $0x2a0] sm:$0xff] }
  0x28   :  { %2332 = vmatpush3.bf16.msra.mxu1 %v2331_v30  ;;  %370 = vmatprep.mubr.f32.mxu1 %v210_v6  ;;  %v154_v30 = vld [vmem:[%s5148_s23 + $0x308] sm:$0xff]  ;;  %v2345_v45 = vpack.c.bf16 %v3120_v33, %v3115_v31  ;;  %v3135_v47 = vld [vmem:[%s5148_s23 + $0x210] sm:$0xff]  ;;  %v173_v60 = vld [vmem:[%s5148_s23 + $0x3a0] sm:$0xff] }
  0x29   :  { %2334 = vmatprep.subr.bf16.mxu1 %v2333_v38  ;;  %v172_v38 = vld [vmem:[%s5148_s23 + $0x398] sm:$0xff]  ;;  %v2375_v44 = vpack.c.bf16 %v154_v30, %v153_v25  ;;  %v155_v49 = vld [vmem:[%s5148_s23 + $0x310] sm:$0xff]  ;;  %v174_v6 = vld [vmem:[%s5148_s23 + $0x3a8] sm:$0xff] }
  0x2a   :  { %2304 = vmatpush3.bf16.msra.mxu0 %v2303_v48  ;;  %v3140_v48 = vld [vmem:[%s5148_s23 + $0x218] sm:$0xff]  ;;  %v158_v25 = vld [vmem:[%s5148_s23 + $0x328] sm:$0xff] }
  0x2b   :  { %2306 = vmatprep.subr.bf16.mxu0 %v2305_v53  ;;  %v156_v53 = vld [vmem:[%s5148_s23 + $0x318] sm:$0xff]  ;;  %v2347_v7 = vpack.c.bf16 %v3140_v48, %v3135_v47 }
  0x2c   :  { %2336 = vmatpush3.bf16.msra.mxu1 %v2335_v52  ;;  %v2377_v52 = vpack.c.bf16 %v172_v38, %v171_v34  ;;  %v2379_v8 = vpack.c.bf16 %v156_v53, %v155_v49  ;;  %v144_v30 = vld [vmem:[%s5148_s23 + $0x2b8] sm:$0xff]  ;;  %v175_v34 = vld [vmem:[%s5148_s23 + $0x3b0] sm:$0xff] }
  0x2d   :  { %2338 = vmatprep.subr.bf16.mxu1 %v2337_v59  ;;  %v142_v59 = vld [vmem:[%s5148_s23 + $0x2a8] sm:$0xff]  ;;  %v176_v38 = vld [vmem:[%s5148_s23 + $0x3b8] sm:$0xff]  ;;  %v159_v53 = vld [vmem:[%s5148_s23 + $0x330] sm:$0xff] }
  0x2e   :  { %2308 = vmatpush3.bf16.msra.mxu0 %v2307_v9  ;;  %v2349_v9 = vpack.c.bf16 %v142_v59, %v141_v58  ;;  %v160_v58 = vld [vmem:[%s5148_s23 + $0x338] sm:$0xff]  ;;  %v2385_v59 = vpack.c.bf16 %v176_v38, %v175_v34 }
  0x2f   :  { %2342 = vmatprep.subr.bf16.mxu0 %v2341_v17  ;;  %v157_v17 = vld [vmem:[%s5148_s23 + $0x320] sm:$0xff] }
  0x30   :  { %2340 = vmatpush3.bf16.msra.mxu1 %v2339_v16  ;;  %v126_v16 = vld [vmem:[%s5148_s23 + $0x228] sm:$0xff] }
  0x31   :  { %2374 = vmatprep.subr.bf16.mxu1 %v2373_v26  ;;  %301 = vmatmul.mubr.f32.vlgmr.msra.gmra.mrb[0].mxu0 %v201_v43  ;;  %v125_v43 = vld [vmem:[%s5148_s23 + $0x220] sm:$0xff]  ;;  %v143_v26 = vld [vmem:[%s5148_s23 + $0x2b0] sm:$0xff] }
  0x32   :  { %2344 = vmatpush3.bf16.msra.mxu0 %v2343_v39  ;;  %v2351_v39 = vpack.c.bf16 %v126_v16, %v125_v43  ;;  %v2353_v49 = vpack.c.bf16 %v144_v30, %v143_v26 }
  0x33   :  { %371 = vmatmul.mubr.f32.vlgmr.msra.gmra.mrb[0].mxu1 %v208_v51  ;;  %2346 = vmatprep.subr.bf16.mxu0 %v2345_v45  ;;  %v2381_v51 = vpack.c.bf16 %v174_v6, %v173_v60  ;;  %v2383_v45 = vpack.c.bf16 %v158_v25, %v157_v17  ;;  %v145_v60 = vld [vmem:[%s5148_s23 + $0x2c0] sm:$0xff]  ;;  %v146_v6 = vld [vmem:[%s5148_s23 + $0x2c8] sm:$0xff] }
  0x34   :  { %2376 = vmatpush3.bf16.msra.mxu1 %v2375_v44  ;;  %v127_v44 = vld [vmem:[%s5148_s23 + $0x230] sm:$0xff] }
  0x35   :  { %2378 = vmatprep.subr.bf16.mxu1 %v2377_v52  ;;  %v128_v52 = vld [vmem:[%s5148_s23 + $0x238] sm:$0xff] }
  0x36   :  { %2348 = vmatpush3.bf16.msra.mxu0 %v2347_v7  ;;  %v177_v7 = vld [vmem:[%s5148_s23 + $0x3c0] sm:$0xff] }
  0x37   :  { %2350 = vmatprep.subr.bf16.mxu0 %v2349_v9  ;;  %v56_v9 = vld [vmem:[%s5150_s1 + $0x8] sm:$0xff] }
  0x38   :  { %2380 = vmatpush3.bf16.msra.mxu1 %v2379_v8  ;;  %v178_v8 = vld [vmem:[%s5148_s23 + $0x3c8] sm:$0xff] }
  0x39   :  { %2382 = vmatprep.subr.bf16.mxu1 %v2381_v51 }
  0x3a   :  { %30 = vsyncpa [#allocation5], 0  ;;  %2352 = vmatpush3.bf16.msra.mxu0 %v2351_v39  ;;  %v2355_v43 = vpack.c.bf16 %v128_v52, %v127_v44  ;;  %v3214_v16 = vrot.slane %v56_v9, %v3007_v21  ;;  %v211_v17 = vcombine.high %v56_v9, %v56_v9  ;;  %v2387_v51 = vpack.c.bf16 %v160_v58, %v159_v53  ;;  %v129_v26 = vld [vmem:[%s5148_s23 + $0x240] sm:$0xff]  ;;  %v130_v30 = vld [vmem:[%s5148_s23 + $0x248] sm:$0xff]  ;;  %s5151_s21 = sld [smem:[#allocation32_spill]]  ;;  %s5159_s26 = sld [smem:[#allocation34_spill]] }
  0x3b   :  { %2354 = vmatprep.subr.bf16.mxu0 %v2353_v49  ;;  %v2357_v25 = vpack.c.bf16 %v146_v6, %v145_v60  ;;  %v161_v34 = vld [vmem:[%s5148_s23 + $0x340] sm:$0xff]  ;;  %v2389_v38 = vpack.c.bf16 %v178_v8, %v177_v7  ;;  %v162_v39 = vld [vmem:[%s5148_s23 + $0x348] sm:$0xff]  ;;  %v147_v44 = vld [vmem:[%s5148_s23 + $0x2d0] sm:$0xff]  ;;  %vm528_vm0 = vcmask 261120   ;;  %vm2668_vm1 = vmmov 0   ;;  %s2670_s22 = smov [#allocation6]  }
  0x3c   :  { %2384 = vmatpush3.bf16.msra.mxu1 %v2383_v45  ;;  %v148_v45 = vld [vmem:[%s5148_s23 + $0x2d8] sm:$0xff]  ;;  %v226_v49 = vcombine.high %v3214_v16, %v3214_v16  ;;  %v225_v52 = vrot.slane %v211_v17, %v3007_v21  ;;  %v179_v53 = vld [vmem:[%s5148_s23 + $0x3d0] sm:$0xff]  ;;  %v2391_v6 = vpack.c.bf16 %v162_v39, %v161_v34  ;;  %v182_v34 = vld [vmem:[%s5148_s23 + $0x3e8] sm:$0xff]  ;;  %vm1404_vm2 = vcmask 64512  }
  0x3d   :  { %2386 = vmatprep.subr.bf16.mxu1 %v2385_v59  ;;  %v180_v58 = vld [vmem:[%s5148_s23 + $0x3d8] sm:$0xff]  ;;  %v2359_v59 = vpack.c.bf16 %v130_v30, %v129_v26  ;;  %v2361_v7 = vpack.c.bf16 %v148_v45, %v147_v44  ;;  %v131_v8 = vld [vmem:[%s5148_s23 + $0x250] sm:$0xff]  ;;  %v150_v26 = vld [vmem:[%s5148_s23 + $0x2e8] sm:$0xff]  ;;  %vm602_vm3 = vcmask 58368   ;;  %vm1402_vm4 = vcmask 253952  }
  0x3e   :  { %2356 = vmatpush3.bf16.msra.mxu0 %v2355_v43  ;;  %440 = vmatprep.mubr.f32.mxu0 %v226_v49  ;;  %v227_v60 = vcombine.high %v225_v52, %v225_v52  ;;  %v132_v9 = vld [vmem:[%s5148_s23 + $0x258] sm:$0xff]  ;;  %v163_v17 = vld [vmem:[%s5148_s23 + $0x350] sm:$0xff]  ;;  %v2393_v43 = vpack.c.bf16 %v180_v58, %v179_v53  ;;  %v181_v30 = vld [vmem:[%s5148_s23 + $0x3e0] sm:$0xff]  ;;  %vm1409_vm5 = vcmask 57344  }
  0x3f   :  { %2358 = vmatprep.subr.bf16.mxu0 %v2357_v25  ;;  %v149_v25 = vld [vmem:[%s5148_s23 + $0x2e0] sm:$0xff]  ;;  %v134_v49 = vld [vmem:[%s5148_s23 + $0x268] sm:$0xff]  ;;  %v2397_v58 = vpack.c.bf16 %v182_v34, %v181_v30  ;;  %v167_v30 = vld [vmem:[%s5148_s23 + $0x370] sm:$0xff] }
  0x40   :  { %2388 = vmatpush3.bf16.msra.mxu1 %v2387_v51  ;;  %v164_v51 = vld [vmem:[%s5148_s23 + $0x358] sm:$0xff]  ;;  %510 = vmatprep.mubr.f32.mxu1 %v227_v60  ;;  %v2365_v44 = vpack.c.bf16 %v150_v26, %v149_v25  ;;  %v133_v45 = vld [vmem:[%s5148_s23 + $0x260] sm:$0xff]  ;;  %v151_v60 = vld [vmem:[%s5148_s23 + $0x2f0] sm:$0xff] }
  0x41   :  { %2390 = vmatprep.subr.bf16.mxu1 %v2389_v38  ;;  %v2363_v38 = vpack.c.bf16 %v132_v9, %v131_v8  ;;  %v2395_v39 = vpack.c.bf16 %v164_v51, %v163_v17  ;;  %v165_v53 = vld [vmem:[%s5148_s23 + $0x360] sm:$0xff]  ;;  %v184_v8 = vld [vmem:[%s5148_s23 + $0x3f8] sm:$0xff]  ;;  %v2367_v9 = vpack.c.bf16 %v134_v49, %v133_v45  ;;  %v135_v51 = vld [vmem:[%s5148_s23 + $0x270] sm:$0xff] }
  0x42   :  { %2360 = vmatpush3.bf16.msra.mxu0 %v2359_v59  ;;  %v166_v59 = vld [vmem:[%s5148_s23 + $0x368] sm:$0xff]  ;;  %v136_v25 = vld [vmem:[%s5148_s23 + $0x278] sm:$0xff] }
  0x43   :  { %2362 = vmatprep.subr.bf16.mxu0 %v2361_v7  ;;  %v183_v7 = vld [vmem:[%s5148_s23 + $0x3f0] sm:$0xff]  ;;  %v2399_v17 = vpack.c.bf16 %v166_v59, %v165_v53  ;;  %v168_v34 = vld [vmem:[%s5148_s23 + $0x378] sm:$0xff]  ;;  %v621_v45 = vld [vmem:[%s5109_s7 + $0x88] sm:$0xff]  ;;  %v1005_v59 = vmul.f32 0.001, %v2788_v1 }
  0x44   :  { %2392 = vmatpush3.bf16.msra.mxu1 %v2391_v6  ;;  %v152_v6 = vld [vmem:[%s5148_s23 + $0x2f8] sm:$0xff]  ;;  %v2401_v26 = vpack.c.bf16 %v184_v8, %v183_v7  ;;  %v749_v53 = vmul.f32 0.999, %v621_v45  ;;  %v989_v1 = vmul.f32 0.001, %v2800_v4 }
  0x45   :  { %2394 = vmatprep.subr.bf16.mxu1 %v2393_v43  ;;  %v2369_v43 = vpack.c.bf16 %v152_v6, %v151_v60  ;;  %v622_v60 = vld [vmem:[%s5109_s7 + $0x90] sm:$0xff]  ;;  %v1007_v4 = vmul.f32 0.001, %v2824_v13 }
  0x46   :  { %2364 = vmatpush3.bf16.msra.mxu0 %v2363_v38  ;;  %v2371_v38 = vpack.c.bf16 %v136_v25, %v135_v51  ;;  %v606_v51 = vld [vmem:[%s5109_s7 + $0x10] sm:$0xff] }
  0x47   :  { %2366 = vmatprep.subr.bf16.mxu0 %v2365_v44  ;;  %v620_v44 = vld [vmem:[%s5109_s7 + $0x80] sm:$0xff] }
  0x48   :  { %2396 = vmatpush3.bf16.msra.mxu1 %v2395_v39  ;;  %v2403_v39 = vpack.c.bf16 %v168_v34, %v167_v30  ;;  %v748_v49 = vmul.f32 0.999, %v620_v44  ;;  %v990_v44 = vmul.f32 0.001, %v2829_v14  ;;  %v608_v14 = vld [vmem:[%s5109_s7 + $0x20] sm:$0xff] }
  0x49   :  { %2398 = vmatprep.subr.bf16.mxu1 %v2397_v58  ;;  %v1004_v58 = vmul.f32 0.001, %v2783_v0  ;;  %v988_v0 = vmul.f32 0.001, %v2793_v2  ;;  %v1006_v2 = vmul.f32 0.001, %v2819_v11 }
  0x4a   :  { %2368 = vmatpush3.bf16.msra.mxu0 %v2367_v9  ;;  %v1133_v9 = vadd.f32 %v1005_v59, %v749_v53  ;;  %v624_v11 = vld [vmem:[%s5109_s7 + $0xa0] sm:$0xff]  ;;  %v991_v53 = vmul.f32 0.001, %v2834_v15  ;;  %v609_v15 = vld [vmem:[%s5109_s7 + $0x28] sm:$0xff] }
  0x4b   :  { %2370 = vmatprep.subr.bf16.mxu0 %v2369_v43  ;;  %v1132_v6 = vadd.f32 %v1004_v58, %v748_v49  ;;  %v750_v43 = vmul.f32 0.999, %v622_v60  ;;  %v625_v58 = vld [vmem:[%s5109_s7 + $0xa8] sm:$0xff] }
  0x4c   :  { %2400 = vmatpush3.bf16.msra.mxu1 %v2399_v17  ;;  %v623_v17 = vld [vmem:[%s5109_s7 + $0x98] sm:$0xff]  ;;  %1291 = vst.msk [vmem:[%s5117_s15 + $0x88] sm:$0xff] %vm528_vm0, %v1133_v9  ;;  %v753_v60 = vmul.f32 0.999, %v625_v58 }
  0x4d   :  { %2402 = vmatprep.subr.bf16.mxu1 %v2401_v26  ;;  %1290 = vst.msk [vmem:[%s5117_s15 + $0x80] sm:$0xff] %vm528_vm0, %v1132_v6  ;;  %v751_v26 = vmul.f32 0.999, %v623_v17  ;;  %v2411_v30 = vpack.c.bf16 %v1133_v9, %v1132_v6  ;;  %v1134_v13 = vadd.f32 %v1006_v2, %v750_v43  ;;  %v626_v6 = vld [vmem:[%s5109_s7 + $0xb0] sm:$0xff]  ;;  %v1009_v9 = vmul.f32 0.001, %v2860_v24 }
  0x4e   :  { %2372 = vmatpush3.bf16.msra.mxu0 %v2371_v38  ;;  %v607_v38 = vld [vmem:[%s5109_s7 + $0x18] sm:$0xff]  ;;  %v610_v17 = vld [vmem:[%s5109_s7 + $0x30] sm:$0xff]  ;;  %v736_v43 = vmul.f32 0.999, %v608_v14  ;;  %v993_v2 = vmul.f32 0.001, %v2872_v28 }
  0x4f   :  { %v1135_v45 = vadd.f32 %v1007_v4, %v751_v26  ;;  %v735_v49 = vmul.f32 0.999, %v607_v38  ;;  %1292 = vst.msk [vmem:[%s5117_s15 + $0x90] sm:$0xff] %vm528_vm0, %v1134_v13  ;;  %v1137_v26 = vadd.f32 %v1009_v9, %v753_v60  ;;  %v611_v4 = vld [vmem:[%s5109_s7 + $0x38] sm:$0xff]  ;;  %v754_v38 = vmul.f32 0.999, %v626_v6 }
  0x50   :  { %2404 = vmatpush3.bf16.msra.mxu1 %v2403_v39  ;;  %v734_v39 = vmul.f32 0.999, %v606_v51  ;;  %v737_v51 = vmul.f32 0.999, %v609_v15  ;;  %v739_v58 = vmul.f32 0.999, %v611_v4 }
  0x51   :  { %441 = vmatmul.mubr.f32.vlgmr.msra.gmra.mrb[2].mxu0 %v3214_v16  ;;  %v604_v16 = vld [vmem:[%s5109_s7] sm:$0xff]  ;;  %2412 = vmatprep.subr.bf16.mxu1 %v2411_v30  ;;  %1293 = vst.msk [vmem:[%s5117_s15 + $0x98] sm:$0xff] %vm528_vm0, %v1135_v45  ;;  %1295 = vst.msk [vmem:[%s5117_s15 + $0xa8] sm:$0xff] %vm528_vm0, %v1137_v26  ;;  %v994_v14 = vmul.f32 0.001, %v2901_v37  ;;  %v614_v4 = vld [vmem:[%s5109_s7 + $0x50] sm:$0xff] }
  0x52   :  { %v732_v7 = vmul.f32 0.999, %v604_v16  ;;  %v1118_v16 = vadd.f32 %v990_v44, %v734_v39  ;;  %v628_v30 = vld [vmem:[%s5109_s7 + $0xc0] sm:$0xff]  ;;  %v1010_v44 = vmul.f32 0.001, %v2891_v35  ;;  %v613_v35 = vld [vmem:[%s5109_s7 + $0x48] sm:$0xff] }
  0x53   :  { %511 = vmatmul.mubr.f32.vlgmr.msra.gmra.mrb[2].mxu1 %v225_v52  ;;  %v605_v52 = vld [vmem:[%s5109_s7 + $0x8] sm:$0xff]  ;;  %v1012_v37 = vmul.f32 0.001, %v2925_v46  ;;  %v996_v46 = vmul.f32 0.001, %v2945_v56 }
  0x54   :  { %v733_v8 = vmul.f32 0.999, %v605_v52  ;;  %v1116_v25 = vadd.f32 %v988_v0, %v732_v7  ;;  %v752_v52 = vmul.f32 0.999, %v624_v11  ;;  %v2415_v7 = vpack.c.bf16 %v1135_v45, %v1134_v13  ;;  %1276 = vst.msk [vmem:[%s5117_s15 + $0x10] sm:$0xff] %vm528_vm0, %v1118_v16 }
  0x55   :  { %v1008_v0 = vmul.f32 0.001, %v2855_v23  ;;  %v992_v23 = vmul.f32 0.001, %v2867_v27  ;;  %v629_v27 = vld [vmem:[%s5109_s7 + $0xc8] sm:$0xff]  ;;  %v1121_v11 = vadd.f32 %v993_v2, %v737_v51 }
  0x56   :  { %v1117_v34 = vadd.f32 %v989_v1, %v733_v8  ;;  %1274 = vst.msk [vmem:[%s5117_s15] sm:$0xff] %vm528_vm0, %v1116_v25  ;;  %v1119_v8 = vadd.f32 %v991_v53, %v735_v49  ;;  %v627_v1 = vld [vmem:[%s5109_s7 + $0xb8] sm:$0xff]  ;;  %v1011_v13 = vmul.f32 0.001, %v2896_v36  ;;  %v738_v45 = vmul.f32 0.999, %v610_v17 }
  0x57   :  { %v755_v39 = vmul.f32 0.999, %v627_v1  ;;  %v612_v49 = vld [vmem:[%s5109_s7 + $0x40] sm:$0xff]  ;;  %v1138_v53 = vadd.f32 %v1010_v44, %v754_v38  ;;  %v995_v36 = vmul.f32 0.001, %v2908_v40  ;;  %1279 = vst.msk [vmem:[%s5117_s15 + $0x28] sm:$0xff] %vm528_vm0, %v1121_v11 }
  0x58   :  { %1275 = vst.msk [vmem:[%s5117_s15 + $0x8] sm:$0xff] %vm528_vm0, %v1117_v34  ;;  %v2413_v59 = vpack.c.bf16 %v1117_v34, %v1116_v25  ;;  %1277 = vst.msk [vmem:[%s5117_s15 + $0x18] sm:$0xff] %vm528_vm0, %v1119_v8  ;;  %v2417_v24 = vpack.c.bf16 %v1119_v8, %v1118_v16  ;;  %v1136_v25 = vadd.f32 %v1008_v0, %v752_v52  ;;  %v756_v52 = vmul.f32 0.999, %v628_v30  ;;  %v631_v8 = vld [vmem:[%s5109_s7 + $0xd8] sm:$0xff] }
  0x59   :  { %v1120_v34 = vadd.f32 %v992_v23, %v736_v43  ;;  %v1139_v16 = vadd.f32 %v1011_v13, %v755_v39  ;;  %v757_v60 = vmul.f32 0.999, %v629_v27  ;;  %1296 = vst.msk [vmem:[%s5117_s15 + $0xb0] sm:$0xff] %vm528_vm0, %v1138_v53  ;;  %v1122_v15 = vadd.f32 %v994_v14, %v738_v45  ;;  %v615_v30 = vld [vmem:[%s5109_s7 + $0x58] sm:$0xff]  ;;  %v633_v13 = vld [vmem:[%s5109_s7 + $0xe8] sm:$0xff] }
  0x5a   :  { %2414 = vmatpush3.bf16.msra.mxu1 %v2413_v59  ;;  %1294 = vst.msk [vmem:[%s5117_s15 + $0xa0] sm:$0xff] %vm528_vm0, %v1136_v25  ;;  %v2419_v28 = vpack.c.bf16 %v1137_v26, %v1136_v25  ;;  %v1123_v6 = vadd.f32 %v995_v36, %v739_v58  ;;  %v1013_v40 = vmul.f32 0.001, %v2930_v50  ;;  %v740_v9 = vmul.f32 0.999, %v612_v49 }
  0x5b   :  { %2416 = vmatprep.subr.bf16.mxu1 %v2415_v7  ;;  %1278 = vst.msk [vmem:[%s5117_s15 + $0x20] sm:$0xff] %vm528_vm0, %v1120_v34  ;;  %v2421_v59 = vpack.c.bf16 %v1121_v11, %v1120_v34  ;;  %v630_v7 = vld [vmem:[%s5109_s7 + $0xd0] sm:$0xff]  ;;  %1297 = vst.msk [vmem:[%s5117_s15 + $0xb8] sm:$0xff] %vm528_vm0, %v1139_v16  ;;  %v2423_v0 = vpack.c.bf16 %v1139_v16, %v1138_v53  ;;  %v741_v1 = vmul.f32 0.999, %v613_v35  ;;  %v632_v11 = vld [vmem:[%s5109_s7 + $0xe0] sm:$0xff] }
  0x5c   :  { %1280 = vst.msk [vmem:[%s5117_s15 + $0x30] sm:$0xff] %vm528_vm0, %v1122_v15  ;;  %1281 = vst.msk [vmem:[%s5117_s15 + $0x38] sm:$0xff] %vm528_vm0, %v1123_v6  ;;  %v2425_v50 = vpack.c.bf16 %v1123_v6, %v1122_v15  ;;  %v1140_v17 = vadd.f32 %v1012_v37, %v756_v52  ;;  %v1141_v43 = vadd.f32 %v1013_v40, %v757_v60  ;;  %v997_v51 = vmul.f32 0.001, %v2950_v57  ;;  %v617_v53 = vld [vmem:[%s5109_s7 + $0x68] sm:$0xff]  ;;  %v517_v16 = vld [vmem:[%s5107_s5] sm:$0xff] }
  0x5d   :  { %v1124_v23 = vadd.f32 %v996_v46, %v740_v9  ;;  %v759_v56 = vmul.f32 0.999, %v631_v8  ;;  %v1014_v25 = vmul.f32 0.001, %v2961_v61  ;;  %v1015_v57 = vmul.f32 0.001, %v2966_v62 }
  0x5e   :  { %2418 = vmatpush3.bf16.msra.mxu1 %v2417_v24  ;;  %v758_v24 = vmul.f32 0.999, %v630_v7  ;;  %1298 = vst.msk [vmem:[%s5117_s15 + $0xc0] sm:$0xff] %vm528_vm0, %v1140_v17  ;;  %1299 = vst.msk [vmem:[%s5117_s15 + $0xc8] sm:$0xff] %vm528_vm0, %v1141_v43  ;;  %v2427_v26 = vpack.c.bf16 %v1141_v43, %v1140_v17  ;;  %v1125_v2 = vadd.f32 %v997_v51, %v741_v1  ;;  %v742_v34 = vmul.f32 0.999, %v614_v4 }
  0x5f   :  { %2420 = vmatprep.subr.bf16.mxu1 %v2419_v28  ;;  %1282 = vst.msk [vmem:[%s5117_s15 + $0x40] sm:$0xff] %vm528_vm0, %v1124_v23  ;;  %v1143_v27 = vadd.f32 %v1015_v57, %v759_v56  ;;  %v743_v38 = vmul.f32 0.999, %v615_v30  ;;  %v998_v39 = vmul.f32 0.001, %v2983_v10  ;;  %v634_v37 = vld [vmem:[%s5109_s7 + $0xf0] sm:$0xff] }
  0x60   :  { %v1142_v61 = vadd.f32 %v1014_v25, %v758_v24  ;;  %1283 = vst.msk [vmem:[%s5117_s15 + $0x48] sm:$0xff] %vm528_vm0, %v1125_v2  ;;  %v2429_v62 = vpack.c.bf16 %v1125_v2, %v1124_v23  ;;  %v999_v44 = vmul.f32 0.001, %v2988_v12  ;;  %v760_v35 = vmul.f32 0.999, %v632_v11  ;;  %v616_v12 = vld [vmem:[%s5109_s7 + $0x60] sm:$0xff] }
  0x61   :  { %1301 = vst.msk [vmem:[%s5117_s15 + $0xd8] sm:$0xff] %vm528_vm0, %v1143_v27  ;;  %v1126_v45 = vadd.f32 %v998_v39, %v742_v34  ;;  %v761_v10 = vmul.f32 0.999, %v633_v13  ;;  %v1016_v58 = vmul.f32 0.001, %v2999_v19  ;;  %v518_v19 = vld [vmem:[%s5107_s5 + $0x8] sm:$0xff] }
  0x62   :  { %2422 = vmatpush3.bf16.msra.mxu1 %v2421_v59  ;;  %1300 = vst.msk [vmem:[%s5117_s15 + $0xd0] sm:$0xff] %vm528_vm0, %v1142_v61  ;;  %v2431_v28 = vpack.c.bf16 %v1143_v27, %v1142_v61  ;;  %v1127_v49 = vadd.f32 %v999_v44, %v743_v38  ;;  %v1017_v14 = vmul.f32 0.001, %v3004_v20  ;;  %v744_v36 = vmul.f32 0.999, %v616_v12  ;;  %v635_v40 = vld [vmem:[%s5109_s7 + $0xf8] sm:$0xff] }
  0x63   :  { %2424 = vmatprep.subr.bf16.mxu1 %v2423_v0  ;;  %1284 = vst.msk [vmem:[%s5117_s15 + $0x50] sm:$0xff] %vm528_vm0, %v1126_v45  ;;  %v745_v20 = vmul.f32 0.999, %v617_v53  ;;  %v1000_v52 = vmul.f32 0.001, %v3020_v29  ;;  %v2406_v60 = vpack.c.bf16 %v518_v19, %v517_v16  ;;  %v1144_v15 = vadd.f32 %v1016_v58, %v760_v35  ;;  %v619_v17 = vld [vmem:[%s5109_s7 + $0x78] sm:$0xff] }
  0x64   :  { %1285 = vst.msk [vmem:[%s5117_s15 + $0x58] sm:$0xff] %vm528_vm0, %v1127_v49  ;;  %v2433_v59 = vpack.c.bf16 %v1127_v49, %v1126_v45  ;;  %v1145_v6 = vadd.f32 %v1017_v14, %v761_v10  ;;  %v5128_v7 = vmov 0.0|0.0   ;;  %v1001_v8 = vmul.f32 0.001, %v3027_v32  ;;  %v652_v2 = vld [vmem:[%s5109_s7 + $0x180] sm:$0xff]  ;;  %v653_v57 = vld [vmem:[%s5109_s7 + $0x188] sm:$0xff] }
  0x65   :  { %2405 = vmatprep.subr.bf16.mxu0 %v5128_v7  ;;  %v1128_v0 = vadd.f32 %v1000_v52, %v744_v36  ;;  %v762_v9 = vmul.f32 0.999, %v634_v37  ;;  %v763_v1 = vmul.f32 0.999, %v635_v40  ;;  %1302 = vst.msk [vmem:[%s5117_s15 + $0xe0] sm:$0xff] %vm528_vm0, %v1144_v15  ;;  %v908_v61 = vld [vmem:[%s5148_s23 + $0x180] sm:$0xff] }
  0x66   :  { %2426 = vmatpush3.bf16.msra.mxu1 %v2425_v50  ;;  %2407 = vmatpush3.bf16.msra.mxu0 %v2406_v60  ;;  %1303 = vst.msk [vmem:[%s5117_s15 + $0xe8] sm:$0xff] %vm528_vm0, %v1145_v6  ;;  %v2435_v29 = vpack.c.bf16 %v1145_v6, %v1144_v15  ;;  %v1018_v46 = vmul.f32 0.001, %v3041_v41  ;;  %v1019_v32 = vmul.f32 0.001, %v3046_v42  ;;  %v618_v50 = vld [vmem:[%s5109_s7 + $0x70] sm:$0xff]  ;;  %v1129_v43 = vadd.f32 %v1001_v8, %v745_v20 }
  0x67   :  { %2428 = vmatprep.subr.bf16.mxu1 %v2427_v26  ;;  %1286 = vst.msk [vmem:[%s5117_s15 + $0x60] sm:$0xff] %vm528_vm0, %v1128_v0  ;;  %2408 = vmatprep.subr.bf16.mxu0 %v5128_v7  ;;  %v519_v41 = vld [vmem:[%s5107_s5 + $0x10] sm:$0xff]  ;;  %v520_v42 = vld [vmem:[%s5107_s5 + $0x18] sm:$0xff]  ;;  %v746_v51 = vmul.f32 0.999, %v618_v50  ;;  %v909_v38 = vld [vmem:[%s5148_s23 + $0x188] sm:$0xff] }
  0x68   :  { %v747_v23 = vmul.f32 0.999, %v619_v17  ;;  %v2409_v24 = vpack.c.bf16 %v520_v42, %v519_v41  ;;  %v1146_v56 = vadd.f32 %v1018_v46, %v762_v9  ;;  %v1147_v25 = vadd.f32 %v1019_v32, %v763_v1  ;;  %1287 = vst.msk [vmem:[%s5117_s15 + $0x68] sm:$0xff] %vm528_vm0, %v1129_v43  ;;  %v636_v39 = vld [vmem:[%s5109_s7 + $0x100] sm:$0xff]  ;;  %v637_v44 = vld [vmem:[%s5109_s7 + $0x108] sm:$0xff]  ;;  %v910_v32 = vld [vmem:[%s5148_s23 + $0x190] sm:$0xff] }
  0x69   :  { %v1002_v26 = vmul.f32 0.001, %v3063_v54  ;;  %v2437_v4 = vpack.c.bf16 %v1129_v43, %v1128_v0  ;;  %v1003_v54 = vmul.f32 0.001, %v3068_v55  ;;  %v780_v30 = vmul.f32 0.999, %v652_v2 }
  0x6a   :  { %2430 = vmatpush3.bf16.msra.mxu1 %v2429_v62  ;;  %v781_v62 = vmul.f32 0.999, %v653_v57  ;;  %2410 = vmatpush3.bf16.msra.mxu0 %v2409_v24  ;;  %1304 = vst.msk [vmem:[%s5117_s15 + $0xf0] sm:$0xff] %vm528_vm0, %v1146_v56  ;;  %1305 = vst.msk [vmem:[%s5117_s15 + $0xf8] sm:$0xff] %vm528_vm0, %v1147_v25  ;;  %v2439_v27 = vpack.c.bf16 %v1147_v25, %v1146_v56  ;;  %v1036_v55 = vmul.f32 0.001, %v908_v61 }
  0x6b   :  { %2432 = vmatprep.subr.bf16.mxu1 %v2431_v28  ;;  %v1130_v34 = vadd.f32 %v1002_v26, %v746_v51  ;;  %v1131_v28 = vadd.f32 %v1003_v54, %v747_v23  ;;  %v1037_v11 = vmul.f32 0.001, %v909_v38  ;;  %v764_v13 = vmul.f32 0.999, %v636_v39  ;;  %v892_v35 = vld [vmem:[%s5148_s23 + $0x100] sm:$0xff]  ;;  %v893_v10 = vld [vmem:[%s5148_s23 + $0x108] sm:$0xff] }
  0x6c   :  { %v765_v45 = vmul.f32 0.999, %v637_v44  ;;  %v1164_v49 = vadd.f32 %v1036_v55, %v780_v30  ;;  %v2559_v12 = vld.sshfl [vmem:[%s5151_s21] sm:$0xff pattern:$0x76325410]  ;;  %v2669_v58 = vmov 0.0  }
  0x6d   :  { %1288 = vst.msk [vmem:[%s5117_s15 + $0x70] sm:$0xff] %vm528_vm0, %v1130_v34  ;;  %1289 = vst.msk [vmem:[%s5117_s15 + $0x78] sm:$0xff] %vm528_vm0, %v1131_v28  ;;  %v2441_v53 = vpack.c.bf16 %v1131_v28, %v1130_v34  ;;  %2263 = vmatprep.mubr.msk.f32.mxu0 %vm2668_vm1, %v2669_v58  ;;  %v1165_v14 = vadd.f32 %v1037_v11, %v781_v62  ;;  %v1020_v36 = vmul.f32 0.001, %v892_v35  ;;  %v684_v16 = vld [vmem:[%s5109_s7 + $0x280] sm:$0xff]  ;;  %v685_v19 = vld [vmem:[%s5109_s7 + $0x288] sm:$0xff] }
  0x6e   :  { %2434 = vmatpush3.bf16.msra.mxu1 %v2433_v59  ;;  %v1021_v59 = vmul.f32 0.001, %v893_v10  ;;  %1322 = vst.msk [vmem:[%s5117_s15 + $0x180] sm:$0xff] %vm528_vm0, %v1164_v49  ;;  %v812_v20 = vmul.f32 0.999, %v684_v16  ;;  %v668_v8 = vld [vmem:[%s5109_s7 + $0x200] sm:$0xff]  ;;  %v1436_v9 = vcombine.high %v2559_v12, %v2559_v12 }
  0x6f   :  { %2436 = vmatprep.subr.bf16.mxu1 %v2435_v29  ;;  %v813_v52 = vmul.f32 0.999, %v685_v19  ;;  %v1068_v60 = vmul.f32 0.001, %v3079_v63  ;;  %1323 = vst.msk [vmem:[%s5117_s15 + $0x188] sm:$0xff] %vm528_vm0, %v1165_v14  ;;  %v2443_v15 = vpack.c.bf16 %v1165_v14, %v1164_v49  ;;  %v3618_v6 = vadd.f32 %v1020_v36, %v764_v13  ;;  %v669_v63 = vld [vmem:[%s5109_s7 + $0x208] sm:$0xff] }
  0x70   :  { %v3620_v37 = vadd.f32 %v1021_v59, %v765_v45  ;;  %v1069_v40 = vmul.f32 0.001, %v3084_v5  ;;  %v654_v0 = vld [vmem:[%s5109_s7 + $0x190] sm:$0xff]  ;;  %v796_v29 = vmul.f32 0.999, %v668_v8  ;;  %v655_v5 = vld [vmem:[%s5109_s7 + $0x198] sm:$0xff]  ;;  %1527 = vmatprep.mubr.f32.mxu1 %v1436_v9 }
  0x71   :  { %v1196_v1 = vadd.f32 %v1068_v60, %v812_v20  ;;  %v797_v46 = vmul.f32 0.999, %v669_v63  ;;  %2444 = vmatprep.subr.bf16.mxu0 %v2443_v15  ;;  %1306 = vst.msk [vmem:[%s5117_s15 + $0x100] sm:$0xff] %vm528_vm0, %v3618_v6  ;;  %v1052_v43 = vmul.f32 0.001, %v3099_v18  ;;  %v911_v42 = vld [vmem:[%s5148_s23 + $0x198] sm:$0xff] }
  0x72   :  { %2438 = vmatpush3.bf16.msra.mxu1 %v2437_v4  ;;  %1307 = vst.msk [vmem:[%s5117_s15 + $0x108] sm:$0xff] %vm528_vm0, %v3620_v37  ;;  %v1197_v17 = vadd.f32 %v1069_v40, %v813_v52  ;;  %v1053_v41 = vmul.f32 0.001, %v3104_v22  ;;  %v638_v51 = vld [vmem:[%s5109_s7 + $0x110] sm:$0xff]  ;;  %v782_v23 = vmul.f32 0.999, %v654_v0 }
  0x73   :  { %2440 = vmatprep.subr.bf16.mxu1 %v2439_v27  ;;  %1354 = vst.msk [vmem:[%s5117_s15 + $0x280] sm:$0xff] %vm528_vm0, %v1196_v1  ;;  %v783_v24 = vmul.f32 0.999, %v655_v5  ;;  %v1038_v56 = vmul.f32 0.001, %v910_v32  ;;  %v1180_v22 = vadd.f32 %v1052_v43, %v796_v29  ;;  %v639_v2 = vld [vmem:[%s5109_s7 + $0x118] sm:$0xff] }
  0x74   :  { %1355 = vst.msk [vmem:[%s5117_s15 + $0x288] sm:$0xff] %vm528_vm0, %v1197_v17  ;;  %v2475_v18 = vpack.c.bf16 %v1197_v17, %v1196_v1  ;;  %v1181_v25 = vadd.f32 %v1053_v41, %v797_v46  ;;  %v1039_v26 = vmul.f32 0.001, %v911_v42  ;;  %v894_v57 = vld [vmem:[%s5148_s23 + $0x110] sm:$0xff]  ;;  %v895_v61 = vld [vmem:[%s5148_s23 + $0x118] sm:$0xff]  ;;  %v656_v16 = vld [vmem:[%s5109_s7 + $0x1a0] sm:$0xff] }
  0x75   :  { %v3675_v4 = vadd.f32 %v1038_v56, %v782_v23  ;;  %v766_v54 = vmul.f32 0.999, %v638_v51  ;;  %v767_v30 = vmul.f32 0.999, %v639_v2  ;;  %v1022_v62 = vmul.f32 0.001, %v894_v57 }
  0x76   :  { %2442 = vmatpush3.bf16.msra.mxu1 %v2441_v53  ;;  %1338 = vst.msk [vmem:[%s5117_s15 + $0x200] sm:$0xff] %vm528_vm0, %v1180_v22  ;;  %1339 = vst.msk [vmem:[%s5117_s15 + $0x208] sm:$0xff] %vm528_vm0, %v1181_v25  ;;  %v2477_v27 = vpack.c.bf16 %v1181_v25, %v1180_v22  ;;  %v3685_v34 = vadd.f32 %v1039_v26, %v783_v24  ;;  %v1023_v38 = vmul.f32 0.001, %v895_v61  ;;  %v686_v55 = vld [vmem:[%s5109_s7 + $0x290] sm:$0xff]  ;;  %v687_v39 = vld [vmem:[%s5109_s7 + $0x298] sm:$0xff] }
  0x77   :  { %2476 = vmatprep.subr.bf16.mxu1 %v2475_v18  ;;  %v1070_v44 = vmul.f32 0.001, %v3115_v31  ;;  %1324 = vst.msk [vmem:[%s5117_s15 + $0x190] sm:$0xff] %vm528_vm0, %v3675_v4  ;;  %v3699_v28 = vadd.f32 %v1022_v62, %v766_v54  ;;  %v814_v11 = vmul.f32 0.999, %v686_v55  ;;  %v670_v35 = vld [vmem:[%s5109_s7 + $0x210] sm:$0xff] }
  0x78   :  { %v815_v13 = vmul.f32 0.999, %v687_v39  ;;  %v1071_v45 = vmul.f32 0.001, %v3120_v33  ;;  %1325 = vst.msk [vmem:[%s5117_s15 + $0x198] sm:$0xff] %vm528_vm0, %v3685_v34  ;;  %v3709_v49 = vadd.f32 %v1023_v38, %v767_v30  ;;  %v671_v33 = vld [vmem:[%s5109_s7 + $0x218] sm:$0xff] }
  0x79   :  { %1528 = vmatmul.mubr.f32.vlgmr.msra.gmra.mrb[4].mxu1 %v2559_v12  ;;  %v1054_v10 = vmul.f32 0.001, %v3135_v47  ;;  %v1055_v12 = vmul.f32 0.001, %v3140_v48  ;;  %1308 = vst.msk [vmem:[%s5117_s15 + $0x110] sm:$0xff] %vm528_vm0, %v3699_v28  ;;  %v1198_v53 = vadd.f32 %v1070_v44, %v814_v11  ;;  %v657_v47 = vld [vmem:[%s5109_s7 + $0x1a8] sm:$0xff] }
  0x7a   :  { %2478 = vmatpush3.bf16.msra.mxu1 %v2477_v27  ;;  %v1199_v14 = vadd.f32 %v1071_v45, %v815_v13  ;;  %v798_v36 = vmul.f32 0.999, %v670_v35  ;;  %v799_v59 = vmul.f32 0.999, %v671_v33  ;;  %1309 = vst.msk [vmem:[%s5117_s15 + $0x118] sm:$0xff] %vm528_vm0, %v3709_v49  ;;  %v912_v52 = vld [vmem:[%s5148_s23 + $0x1a0] sm:$0xff] }
  0x7b   :  { %v784_v19 = vmul.f32 0.999, %v656_v16  ;;  %v785_v20 = vmul.f32 0.999, %v657_v47  ;;  %v913_v60 = vld [vmem:[%s5148_s23 + $0x1a8] sm:$0xff]  ;;  %1356 = vst.msk [vmem:[%s5117_s15 + $0x290] sm:$0xff] %vm528_vm0, %v1198_v53 }
  0x7c   :  { %1357 = vst.msk [vmem:[%s5117_s15 + $0x298] sm:$0xff] %vm528_vm0, %v1199_v14  ;;  %v2479_v15 = vpack.c.bf16 %v1199_v14, %v1198_v53  ;;  %v1182_v40 = vadd.f32 %v1054_v10, %v798_v36  ;;  %v1183_v8 = vadd.f32 %v1055_v12, %v799_v59  ;;  %v1040_v63 = vmul.f32 0.001, %v912_v52  ;;  %v640_v0 = vld [vmem:[%s5109_s7 + $0x120] sm:$0xff]  ;;  %v641_v9 = vld [vmem:[%s5109_s7 + $0x128] sm:$0xff]  ;;  %v658_v44 = vld [vmem:[%s5109_s7 + $0x1b0] sm:$0xff] }
  0x7d   :  { %v896_v1 = vld [vmem:[%s5148_s23 + $0x120] sm:$0xff]  ;;  %v1041_v29 = vmul.f32 0.001, %v913_v60  ;;  %v768_v46 = vmul.f32 0.999, %v640_v0  ;;  %v897_v43 = vld [vmem:[%s5148_s23 + $0x128] sm:$0xff] }
  0x7e   :  { %v769_v5 = vmul.f32 0.999, %v641_v9  ;;  %2480 = vmatprep.subr.bf16.mxu1 %v2479_v15  ;;  %1340 = vst.msk [vmem:[%s5117_s15 + $0x210] sm:$0xff] %vm528_vm0, %v1182_v40  ;;  %1341 = vst.msk [vmem:[%s5117_s15 + $0x218] sm:$0xff] %vm528_vm0, %v1183_v8  ;;  %v2481_v32 = vpack.c.bf16 %v1183_v8, %v1182_v40  ;;  %v3768_v17 = vadd.f32 %v1040_v63, %v784_v19  ;;  %v1024_v41 = vmul.f32 0.001, %v896_v1 }
  0x7f   :  { %v688_v42 = vld [vmem:[%s5109_s7 + $0x2a0] sm:$0xff]  ;;  %v689_v51 = vld [vmem:[%s5109_s7 + $0x2a8] sm:$0xff]  ;;  %v3779_v23 = vadd.f32 %v1041_v29, %v785_v20  ;;  %v1025_v24 = vmul.f32 0.001, %v897_v43  ;;  %v659_v33 = vld [vmem:[%s5109_s7 + $0x1b8] sm:$0xff] }
  0x80   :  { %v816_v56 = vmul.f32 0.999, %v688_v42  ;;  %v817_v18 = vmul.f32 0.999, %v689_v51  ;;  %2482 = vmatpush3.bf16.msra.mxu1 %v2481_v32  ;;  %1326 = vst.msk [vmem:[%s5117_s15 + $0x1a0] sm:$0xff] %vm528_vm0, %v3768_v17  ;;  %v3786_v22 = vadd.f32 %v1024_v41, %v768_v46  ;;  %v944_v25 = vld [vmem:[%s5148_s23 + $0x2a0] sm:$0xff] }
  0x81   :  { %v945_v26 = vld [vmem:[%s5148_s23 + $0x2a8] sm:$0xff]  ;;  %v672_v2 = vld [vmem:[%s5109_s7 + $0x220] sm:$0xff]  ;;  %1327 = vst.msk [vmem:[%s5117_s15 + $0x1a8] sm:$0xff] %vm528_vm0, %v3779_v23  ;;  %v3804_v61 = vadd.f32 %v1025_v24, %v769_v5  ;;  %v1072_v54 = vmul.f32 0.001, %v944_v25  ;;  %v914_v10 = vld [vmem:[%s5148_s23 + $0x1b0] sm:$0xff] }
  0x82   :  { %v1073_v30 = vmul.f32 0.001, %v945_v26  ;;  %v673_v62 = vld [vmem:[%s5109_s7 + $0x228] sm:$0xff]  ;;  %v928_v27 = vld [vmem:[%s5148_s23 + $0x220] sm:$0xff]  ;;  %1310 = vst.msk [vmem:[%s5117_s15 + $0x120] sm:$0xff] %vm528_vm0, %v3786_v22  ;;  %v915_v12 = vld [vmem:[%s5148_s23 + $0x1b8] sm:$0xff] }
  0x83   :  { %v800_v38 = vmul.f32 0.999, %v672_v2  ;;  %v801_v55 = vmul.f32 0.999, %v673_v62  ;;  %v929_v39 = vld [vmem:[%s5148_s23 + $0x228] sm:$0xff]  ;;  %1311 = vst.msk [vmem:[%s5117_s15 + $0x128] sm:$0xff] %vm528_vm0, %v3804_v61  ;;  %v1200_v13 = vadd.f32 %v1072_v54, %v816_v56 }
  0x84   :  { %v1201_v45 = vadd.f32 %v1073_v30, %v817_v18  ;;  %v1056_v35 = vmul.f32 0.001, %v928_v27  ;;  %v1057_v53 = vmul.f32 0.001, %v929_v39  ;;  %v786_v14 = vmul.f32 0.999, %v658_v44 }
  0x85   :  { %v787_v36 = vmul.f32 0.999, %v659_v33  ;;  %1358 = vst.msk [vmem:[%s5117_s15 + $0x2a0] sm:$0xff] %vm528_vm0, %v1200_v13  ;;  %v1042_v47 = vmul.f32 0.001, %v914_v10  ;;  %v642_v20 = vld [vmem:[%s5109_s7 + $0x130] sm:$0xff] }
  0x86   :  { %1359 = vst.msk [vmem:[%s5117_s15 + $0x2a8] sm:$0xff] %vm528_vm0, %v1201_v45  ;;  %v2483_v59 = vpack.c.bf16 %v1201_v45, %v1200_v13  ;;  %v1184_v16 = vadd.f32 %v1056_v35, %v800_v38  ;;  %v1043_v19 = vmul.f32 0.001, %v915_v12  ;;  %v643_v52 = vld [vmem:[%s5109_s7 + $0x138] sm:$0xff]  ;;  %v1185_v60 = vadd.f32 %v1057_v53, %v801_v55  ;;  %v898_v8 = vld [vmem:[%s5148_s23 + $0x130] sm:$0xff]  ;;  %v660_v13 = vld [vmem:[%s5109_s7 + $0x1c0] sm:$0xff] }
  0x87   :  { %v770_v15 = vmul.f32 0.999, %v642_v20  ;;  %v771_v40 = vmul.f32 0.999, %v643_v52  ;;  %v899_v63 = vld [vmem:[%s5148_s23 + $0x138] sm:$0xff]  ;;  %v3863_v0 = vadd.f32 %v1042_v47, %v786_v14  ;;  %v690_v46 = vld [vmem:[%s5109_s7 + $0x2b0] sm:$0xff] }
  0x88   :  { %2484 = vmatprep.subr.bf16.mxu1 %v2483_v59  ;;  %1342 = vst.msk [vmem:[%s5117_s15 + $0x220] sm:$0xff] %vm528_vm0, %v1184_v16  ;;  %v3865_v9 = vadd.f32 %v1043_v19, %v787_v36  ;;  %v1026_v1 = vmul.f32 0.001, %v898_v8  ;;  %v1027_v29 = vmul.f32 0.001, %v899_v63  ;;  %v691_v5 = vld [vmem:[%s5109_s7 + $0x2b8] sm:$0xff]  ;;  %v2485_v32 = vpack.c.bf16 %v1185_v60, %v1184_v16 }
  0x89   :  { %1343 = vst.msk [vmem:[%s5117_s15 + $0x228] sm:$0xff] %vm528_vm0, %v1185_v60  ;;  %v818_v43 = vmul.f32 0.999, %v690_v46  ;;  %v819_v41 = vmul.f32 0.999, %v691_v5  ;;  %v946_v42 = vld [vmem:[%s5148_s23 + $0x2b0] sm:$0xff] }
  0x8a   :  { %v947_v51 = vld [vmem:[%s5148_s23 + $0x2b8] sm:$0xff]  ;;  %1328 = vst.msk [vmem:[%s5117_s15 + $0x1b0] sm:$0xff] %vm528_vm0, %v3863_v0  ;;  %1329 = vst.msk [vmem:[%s5117_s15 + $0x1b8] sm:$0xff] %vm528_vm0, %v3865_v9  ;;  %v3895_v56 = vadd.f32 %v1026_v1, %v770_v15  ;;  %v3897_v18 = vadd.f32 %v1027_v29, %v771_v40  ;;  %v1074_v25 = vmul.f32 0.001, %v946_v42  ;;  %v674_v26 = vld [vmem:[%s5109_s7 + $0x230] sm:$0xff]  ;;  %2486 = vmatpush3.bf16.msra.mxu1 %v2485_v32 }
  0x8b   :  { %v675_v2 = vld [vmem:[%s5109_s7 + $0x238] sm:$0xff]  ;;  %v930_v54 = vld [vmem:[%s5148_s23 + $0x230] sm:$0xff]  ;;  %v1075_v30 = vmul.f32 0.001, %v947_v51  ;;  %v802_v62 = vmul.f32 0.999, %v674_v26 }
  0x8c   :  { %v803_v27 = vmul.f32 0.999, %v675_v2  ;;  %1312 = vst.msk [vmem:[%s5117_s15 + $0x130] sm:$0xff] %vm528_vm0, %v3895_v56  ;;  %1313 = vst.msk [vmem:[%s5117_s15 + $0x138] sm:$0xff] %vm528_vm0, %v3897_v18  ;;  %v1202_v55 = vadd.f32 %v1074_v25, %v818_v43  ;;  %v931_v39 = vld [vmem:[%s5148_s23 + $0x238] sm:$0xff]  ;;  %v661_v45 = vld [vmem:[%s5109_s7 + $0x1c8] sm:$0xff] }
  0x8d   :  { %v1058_v44 = vmul.f32 0.001, %v930_v54  ;;  %v1203_v35 = vadd.f32 %v1075_v30, %v819_v41  ;;  %v1059_v33 = vmul.f32 0.001, %v931_v39  ;;  %v788_v10 = vmul.f32 0.999, %v660_v13 }
  0x8e   :  { %v789_v12 = vmul.f32 0.999, %v661_v45  ;;  %1360 = vst.msk [vmem:[%s5117_s15 + $0x2b0] sm:$0xff] %vm528_vm0, %v1202_v55  ;;  %v916_v14 = vld [vmem:[%s5148_s23 + $0x1c0] sm:$0xff]  ;;  %v917_v36 = vld [vmem:[%s5148_s23 + $0x1c8] sm:$0xff] }
  0x8f   :  { %v1186_v53 = vadd.f32 %v1058_v44, %v802_v62  ;;  %v644_v59 = vld [vmem:[%s5109_s7 + $0x140] sm:$0xff]  ;;  %1361 = vst.msk [vmem:[%s5117_s15 + $0x2b8] sm:$0xff] %vm528_vm0, %v1203_v35  ;;  %v2487_v16 = vpack.c.bf16 %v1203_v35, %v1202_v55  ;;  %v1187_v47 = vadd.f32 %v1059_v33, %v803_v27  ;;  %v1044_v19 = vmul.f32 0.001, %v916_v14  ;;  %v645_v52 = vld [vmem:[%s5109_s7 + $0x148] sm:$0xff]  ;;  %v663_v14 = vld [vmem:[%s5109_s7 + $0x1d8] sm:$0xff] }
  0x90   :  { %v1045_v20 = vmul.f32 0.001, %v917_v36  ;;  %v900_v60 = vld [vmem:[%s5148_s23 + $0x140] sm:$0xff]  ;;  %v772_v15 = vmul.f32 0.999, %v644_v59  ;;  %v901_v8 = vld [vmem:[%s5148_s23 + $0x148] sm:$0xff] }
  0x91   :  { %1344 = vst.msk [vmem:[%s5117_s15 + $0x230] sm:$0xff] %vm528_vm0, %v1186_v53  ;;  %v773_v40 = vmul.f32 0.999, %v645_v52  ;;  %v692_v63 = vld [vmem:[%s5109_s7 + $0x2c0] sm:$0xff]  ;;  %2488 = vmatprep.subr.bf16.mxu1 %v2487_v16  ;;  %1345 = vst.msk [vmem:[%s5117_s15 + $0x238] sm:$0xff] %vm528_vm0, %v1187_v47  ;;  %v2489_v1 = vpack.c.bf16 %v1187_v47, %v1186_v53  ;;  %v3966_v29 = vadd.f32 %v1044_v19, %v788_v10  ;;  %v693_v32 = vld [vmem:[%s5109_s7 + $0x2c8] sm:$0xff] }
  0x92   :  { %v3968_v46 = vadd.f32 %v1045_v20, %v789_v12  ;;  %v1028_v5 = vmul.f32 0.001, %v900_v60  ;;  %v948_v43 = vld [vmem:[%s5148_s23 + $0x2c0] sm:$0xff]  ;;  %v949_v41 = vld [vmem:[%s5148_s23 + $0x2c8] sm:$0xff]  ;;  %v1029_v42 = vmul.f32 0.001, %v901_v8 }
  0x93   :  { %v820_v51 = vmul.f32 0.999, %v692_v63  ;;  %v821_v25 = vmul.f32 0.999, %v693_v32  ;;  %2490 = vmatpush3.bf16.msra.mxu1 %v2489_v1  ;;  %1330 = vst.msk [vmem:[%s5117_s15 + $0x1c0] sm:$0xff] %vm528_vm0, %v3966_v29  ;;  %v676_v62 = vld [vmem:[%s5109_s7 + $0x240] sm:$0xff] }
  0x94   :  { %1331 = vst.msk [vmem:[%s5117_s15 + $0x1c8] sm:$0xff] %vm528_vm0, %v3968_v46  ;;  %v3991_v2 = vadd.f32 %v1028_v5, %v772_v15  ;;  %v1076_v54 = vmul.f32 0.001, %v948_v43  ;;  %v1077_v30 = vmul.f32 0.001, %v949_v41  ;;  %v677_v27 = vld [vmem:[%s5109_s7 + $0x248] sm:$0xff]  ;;  %v3999_v55 = vadd.f32 %v1029_v42, %v773_v40 }
  0x95   :  { %v804_v39 = vmul.f32 0.999, %v676_v62  ;;  %v805_v44 = vmul.f32 0.999, %v677_v27  ;;  %v932_v13 = vld [vmem:[%s5148_s23 + $0x240] sm:$0xff]  ;;  %v933_v45 = vld [vmem:[%s5148_s23 + $0x248] sm:$0xff] }
  0x96   :  { %1314 = vst.msk [vmem:[%s5117_s15 + $0x140] sm:$0xff] %vm528_vm0, %v3991_v2  ;;  %v1204_v35 = vadd.f32 %v1076_v54, %v820_v51  ;;  %v1205_v33 = vadd.f32 %v1077_v30, %v821_v25  ;;  %v1060_v10 = vmul.f32 0.001, %v932_v13  ;;  %v1061_v12 = vmul.f32 0.001, %v933_v45  ;;  %v662_v53 = vld [vmem:[%s5109_s7 + $0x1d0] sm:$0xff] }
  0x97   :  { %1315 = vst.msk [vmem:[%s5117_s15 + $0x148] sm:$0xff] %vm528_vm0, %v3999_v55  ;;  %v790_v59 = vmul.f32 0.999, %v662_v53  ;;  %v791_v16 = vmul.f32 0.999, %v663_v14  ;;  %v918_v47 = vld [vmem:[%s5148_s23 + $0x1d0] sm:$0xff] }
  0x98   :  { %v919_v19 = vld [vmem:[%s5148_s23 + $0x1d8] sm:$0xff]  ;;  %1362 = vst.msk [vmem:[%s5117_s15 + $0x2c0] sm:$0xff] %vm528_vm0, %v1204_v35  ;;  %1363 = vst.msk [vmem:[%s5117_s15 + $0x2c8] sm:$0xff] %vm528_vm0, %v1205_v33  ;;  %v2491_v20 = vpack.c.bf16 %v1205_v33, %v1204_v35  ;;  %v1188_v52 = vadd.f32 %v1060_v10, %v804_v39  ;;  %v1189_v60 = vadd.f32 %v1061_v12, %v805_v44  ;;  %v1046_v15 = vmul.f32 0.001, %v918_v47  ;;  %v646_v40 = vld [vmem:[%s5109_s7 + $0x150] sm:$0xff] }
  0x99   :  { %v647_v8 = vld [vmem:[%s5109_s7 + $0x158] sm:$0xff]  ;;  %v902_v63 = vld [vmem:[%s5148_s23 + $0x150] sm:$0xff]  ;;  %v1047_v1 = vmul.f32 0.001, %v919_v19  ;;  %v774_v5 = vmul.f32 0.999, %v646_v40 }
  0x9a   :  { %v775_v32 = vmul.f32 0.999, %v647_v8  ;;  %2492 = vmatprep.subr.bf16.mxu1 %v2491_v20  ;;  %1346 = vst.msk [vmem:[%s5117_s15 + $0x240] sm:$0xff] %vm528_vm0, %v1188_v52  ;;  %1347 = vst.msk [vmem:[%s5117_s15 + $0x248] sm:$0xff] %vm528_vm0, %v1189_v60  ;;  %v2493_v43 = vpack.c.bf16 %v1189_v60, %v1188_v52  ;;  %v4056_v41 = vadd.f32 %v1046_v15, %v790_v59  ;;  %v903_v42 = vld [vmem:[%s5148_s23 + $0x158] sm:$0xff]  ;;  %v694_v25 = vld [vmem:[%s5109_s7 + $0x2d0] sm:$0xff] }
  0x9b   :  { %v1030_v51 = vmul.f32 0.001, %v902_v63  ;;  %v695_v54 = vld [vmem:[%s5109_s7 + $0x2d8] sm:$0xff]  ;;  %v4067_v30 = vadd.f32 %v1047_v1, %v791_v16  ;;  %v1031_v62 = vmul.f32 0.001, %v903_v42  ;;  %v950_v13 = vld [vmem:[%s5148_s23 + $0x2d0] sm:$0xff] }
  0x9c   :  { %v822_v27 = vmul.f32 0.999, %v694_v25  ;;  %v823_v39 = vmul.f32 0.999, %v695_v54  ;;  %2494 = vmatpush3.bf16.msra.mxu1 %v2493_v43  ;;  %1332 = vst.msk [vmem:[%s5117_s15 + $0x1d0] sm:$0xff] %vm528_vm0, %v4056_v41  ;;  %v951_v45 = vld [vmem:[%s5148_s23 + $0x2d8] sm:$0xff] }
  0x9d   :  { %v4074_v44 = vadd.f32 %v1030_v51, %v774_v5  ;;  %v678_v35 = vld [vmem:[%s5109_s7 + $0x250] sm:$0xff]  ;;  %1333 = vst.msk [vmem:[%s5117_s15 + $0x1d8] sm:$0xff] %vm528_vm0, %v4067_v30  ;;  %v4092_v10 = vadd.f32 %v1031_v62, %v775_v32  ;;  %v1078_v12 = vmul.f32 0.001, %v950_v13  ;;  %v1079_v53 = vmul.f32 0.001, %v951_v45 }
  0x9e   :  { %v679_v14 = vld [vmem:[%s5109_s7 + $0x258] sm:$0xff]  ;;  %v934_v59 = vld [vmem:[%s5148_s23 + $0x250] sm:$0xff]  ;;  %v806_v16 = vmul.f32 0.999, %v678_v35  ;;  %v664_v20 = vld [vmem:[%s5109_s7 + $0x1e0] sm:$0xff] }
  0x9f   :  { %1316 = vst.msk [vmem:[%s5117_s15 + $0x150] sm:$0xff] %vm528_vm0, %v4074_v44  ;;  %v807_v47 = vmul.f32 0.999, %v679_v14  ;;  %v935_v19 = vld [vmem:[%s5148_s23 + $0x258] sm:$0xff]  ;;  %1317 = vst.msk [vmem:[%s5117_s15 + $0x158] sm:$0xff] %vm528_vm0, %v4092_v10  ;;  %v1206_v60 = vadd.f32 %v1078_v12, %v822_v27  ;;  %v1207_v15 = vadd.f32 %v1079_v53, %v823_v39  ;;  %v665_v8 = vld [vmem:[%s5109_s7 + $0x1e8] sm:$0xff] }
  0xa0   :  { %v1062_v40 = vmul.f32 0.001, %v934_v59  ;;  %v920_v63 = vld [vmem:[%s5148_s23 + $0x1e0] sm:$0xff]  ;;  %v921_v1 = vld [vmem:[%s5148_s23 + $0x1e8] sm:$0xff]  ;;  %v1063_v5 = vmul.f32 0.001, %v935_v19 }
  0xa1   :  { %v792_v32 = vmul.f32 0.999, %v664_v20  ;;  %v793_v43 = vmul.f32 0.999, %v665_v8  ;;  %1364 = vst.msk [vmem:[%s5117_s15 + $0x2d0] sm:$0xff] %vm528_vm0, %v1206_v60  ;;  %1365 = vst.msk [vmem:[%s5117_s15 + $0x2d8] sm:$0xff] %vm528_vm0, %v1207_v15  ;;  %v2495_v42 = vpack.c.bf16 %v1207_v15, %v1206_v60 }
  0xa2   :  { %v1190_v51 = vadd.f32 %v1062_v40, %v806_v16  ;;  %v1048_v25 = vmul.f32 0.001, %v920_v63  ;;  %v1049_v54 = vmul.f32 0.001, %v921_v1  ;;  %v648_v62 = vld [vmem:[%s5109_s7 + $0x160] sm:$0xff]  ;;  %v649_v27 = vld [vmem:[%s5109_s7 + $0x168] sm:$0xff]  ;;  %v1191_v39 = vadd.f32 %v1063_v5, %v807_v47 }
  0xa3   :  { %v776_v13 = vmul.f32 0.999, %v648_v62  ;;  %v777_v45 = vmul.f32 0.999, %v649_v27  ;;  %v904_v35 = vld [vmem:[%s5148_s23 + $0x160] sm:$0xff]  ;;  %v905_v12 = vld [vmem:[%s5148_s23 + $0x168] sm:$0xff]  ;;  %2496 = vmatprep.subr.bf16.mxu1 %v2495_v42 }
  0xa4   :  { %1348 = vst.msk [vmem:[%s5117_s15 + $0x250] sm:$0xff] %vm528_vm0, %v1190_v51  ;;  %v4151_v53 = vadd.f32 %v1048_v25, %v792_v32  ;;  %v4153_v14 = vadd.f32 %v1049_v54, %v793_v43  ;;  %v1032_v59 = vmul.f32 0.001, %v904_v35  ;;  %v1033_v16 = vmul.f32 0.001, %v905_v12  ;;  %v696_v47 = vld [vmem:[%s5109_s7 + $0x2e0] sm:$0xff] }
  0xa5   :  { %v697_v19 = vld [vmem:[%s5109_s7 + $0x2e8] sm:$0xff]  ;;  %1349 = vst.msk [vmem:[%s5117_s15 + $0x258] sm:$0xff] %vm528_vm0, %v1191_v39  ;;  %v2497_v20 = vpack.c.bf16 %v1191_v39, %v1190_v51  ;;  %v824_v60 = vmul.f32 0.999, %v696_v47  ;;  %v952_v40 = vld [vmem:[%s5148_s23 + $0x2e0] sm:$0xff]  ;;  %v666_v35 = vld [vmem:[%s5109_s7 + $0x1f0] sm:$0xff] }
  0xa6   :  { %v825_v15 = vmul.f32 0.999, %v697_v19  ;;  %v953_v8 = vld [vmem:[%s5148_s23 + $0x2e8] sm:$0xff]  ;;  %1334 = vst.msk [vmem:[%s5117_s15 + $0x1e0] sm:$0xff] %vm528_vm0, %v4151_v53  ;;  %1335 = vst.msk [vmem:[%s5117_s15 + $0x1e8] sm:$0xff] %vm528_vm0, %v4153_v14  ;;  %v4183_v1 = vadd.f32 %v1032_v59, %v776_v13  ;;  %v4185_v5 = vadd.f32 %v1033_v16, %v777_v45  ;;  %v680_v43 = vld [vmem:[%s5109_s7 + $0x260] sm:$0xff] }
  0xa7   :  { %v1080_v32 = vmul.f32 0.001, %v952_v40  ;;  %v681_v42 = vld [vmem:[%s5109_s7 + $0x268] sm:$0xff]  ;;  %v936_v51 = vld [vmem:[%s5148_s23 + $0x260] sm:$0xff]  ;;  %2498 = vmatpush3.bf16.msra.mxu1 %v2497_v20  ;;  %v1081_v25 = vmul.f32 0.001, %v953_v8 }
  0xa8   :  { %v808_v54 = vmul.f32 0.999, %v680_v43  ;;  %v809_v62 = vmul.f32 0.999, %v681_v42  ;;  %1318 = vst.msk [vmem:[%s5117_s15 + $0x160] sm:$0xff] %vm528_vm0, %v4183_v1  ;;  %1319 = vst.msk [vmem:[%s5117_s15 + $0x168] sm:$0xff] %vm528_vm0, %v4185_v5 }
  0xa9   :  { %v1208_v39 = vadd.f32 %v1080_v32, %v824_v60  ;;  %v937_v13 = vld [vmem:[%s5148_s23 + $0x268] sm:$0xff]  ;;  %v1064_v45 = vmul.f32 0.001, %v936_v51  ;;  %v667_v12 = vld [vmem:[%s5109_s7 + $0x1f8] sm:$0xff]  ;;  %v1209_v59 = vadd.f32 %v1081_v25, %v825_v15  ;;  %v794_v47 = vmul.f32 0.999, %v666_v35 }
  0xaa   :  { %v1065_v16 = vmul.f32 0.001, %v937_v13  ;;  %v795_v19 = vmul.f32 0.999, %v667_v12  ;;  %v922_v60 = vld [vmem:[%s5148_s23 + $0x1f0] sm:$0xff]  ;;  %v923_v40 = vld [vmem:[%s5148_s23 + $0x1f8] sm:$0xff] }
  0xab   :  { %1366 = vst.msk [vmem:[%s5117_s15 + $0x2e0] sm:$0xff] %vm528_vm0, %v1208_v39  ;;  %v1192_v20 = vadd.f32 %v1064_v45, %v808_v54  ;;  %v650_v15 = vld [vmem:[%s5109_s7 + $0x170] sm:$0xff]  ;;  %1367 = vst.msk [vmem:[%s5117_s15 + $0x2e8] sm:$0xff] %vm528_vm0, %v1209_v59  ;;  %v2499_v8 = vpack.c.bf16 %v1209_v59, %v1208_v39  ;;  %v1050_v43 = vmul.f32 0.001, %v922_v60  ;;  %v651_v51 = vld [vmem:[%s5109_s7 + $0x178] sm:$0xff] }
  0xac   :  { %v1193_v32 = vadd.f32 %v1065_v16, %v809_v62  ;;  %v1051_v42 = vmul.f32 0.001, %v923_v40  ;;  %v906_v25 = vld [vmem:[%s5148_s23 + $0x170] sm:$0xff]  ;;  %v778_v54 = vmul.f32 0.999, %v650_v15  ;;  %v907_v62 = vld [vmem:[%s5148_s23 + $0x178] sm:$0xff] }
  0xad   :  { %1350 = vst.msk [vmem:[%s5117_s15 + $0x260] sm:$0xff] %vm528_vm0, %v1192_v20  ;;  %v779_v13 = vmul.f32 0.999, %v651_v51  ;;  %v698_v39 = vld [vmem:[%s5109_s7 + $0x2f0] sm:$0xff]  ;;  %2500 = vmatprep.subr.bf16.mxu1 %v2499_v8  ;;  %v4254_v35 = vadd.f32 %v1050_v43, %v794_v47  ;;  %v1034_v59 = vmul.f32 0.001, %v906_v25 }
  0xae   :  { %1351 = vst.msk [vmem:[%s5117_s15 + $0x268] sm:$0xff] %vm528_vm0, %v1193_v32  ;;  %v2501_v45 = vpack.c.bf16 %v1193_v32, %v1192_v20  ;;  %v4256_v12 = vadd.f32 %v1051_v42, %v795_v19  ;;  %v699_v16 = vld [vmem:[%s5109_s7 + $0x2f8] sm:$0xff]  ;;  %v954_v60 = vld [vmem:[%s5148_s23 + $0x2f0] sm:$0xff]  ;;  %v1035_v15 = vmul.f32 0.001, %v907_v62  ;;  %v701_v47 = vld [vmem:[%s5109_s7 + $0x308] sm:$0xff] }
  0xaf   :  { %v955_v40 = vld [vmem:[%s5148_s23 + $0x2f8] sm:$0xff]  ;;  %v826_v8 = vmul.f32 0.999, %v698_v39  ;;  %v827_v20 = vmul.f32 0.999, %v699_v16  ;;  %1336 = vst.msk [vmem:[%s5117_s15 + $0x1f0] sm:$0xff] %vm528_vm0, %v4254_v35  ;;  %v4279_v19 = vadd.f32 %v1034_v59, %v778_v54 }
  0xb0   :  { %2502 = vmatpush3.bf16.msra.mxu1 %v2501_v45  ;;  %1337 = vst.msk [vmem:[%s5117_s15 + $0x1f8] sm:$0xff] %vm528_vm0, %v4256_v12  ;;  %v1082_v32 = vmul.f32 0.001, %v954_v60  ;;  %v1083_v43 = vmul.f32 0.001, %v955_v40  ;;  %v682_v42 = vld [vmem:[%s5109_s7 + $0x270] sm:$0xff]  ;;  %v4287_v25 = vadd.f32 %v1035_v15, %v779_v13 }
  0xb1   :  { %v683_v51 = vld [vmem:[%s5109_s7 + $0x278] sm:$0xff]  ;;  %v810_v62 = vmul.f32 0.999, %v682_v42  ;;  %v938_v45 = vld [vmem:[%s5148_s23 + $0x270] sm:$0xff]  ;;  %1320 = vst.msk [vmem:[%s5117_s15 + $0x170] sm:$0xff] %vm528_vm0, %v4279_v19  ;;  %v716_v40 = vld [vmem:[%s5109_s7 + $0x380] sm:$0xff] }
  0xb2   :  { %v811_v39 = vmul.f32 0.999, %v683_v51  ;;  %v939_v54 = vld [vmem:[%s5148_s23 + $0x278] sm:$0xff]  ;;  %v1210_v59 = vadd.f32 %v1082_v32, %v826_v8  ;;  %v1211_v16 = vadd.f32 %v1083_v43, %v827_v20  ;;  %v1066_v13 = vmul.f32 0.001, %v938_v45  ;;  %v717_v15 = vld [vmem:[%s5109_s7 + $0x388] sm:$0xff] }
  0xb3   :  { %v1067_v60 = vmul.f32 0.001, %v939_v54  ;;  %1321 = vst.msk [vmem:[%s5117_s15 + $0x178] sm:$0xff] %vm528_vm0, %v4287_v25  ;;  %v844_v20 = vmul.f32 0.999, %v716_v40  ;;  %v972_v43 = vld [vmem:[%s5148_s23 + $0x380] sm:$0xff] }
  0xb4   :  { %v845_v32 = vmul.f32 0.999, %v717_v15  ;;  %v973_v42 = vld [vmem:[%s5148_s23 + $0x388] sm:$0xff]  ;;  %1368 = vst.msk [vmem:[%s5117_s15 + $0x2f0] sm:$0xff] %vm528_vm0, %v1210_v59  ;;  %1369 = vst.msk [vmem:[%s5117_s15 + $0x2f8] sm:$0xff] %vm528_vm0, %v1211_v16  ;;  %v2503_v51 = vpack.c.bf16 %v1211_v16, %v1210_v59  ;;  %v1194_v45 = vadd.f32 %v1066_v13, %v810_v62  ;;  %v700_v8 = vld [vmem:[%s5109_s7 + $0x300] sm:$0xff] }
  0xb5   :  { %v1195_v54 = vadd.f32 %v1067_v60, %v811_v39  ;;  %v1100_v40 = vmul.f32 0.001, %v972_v43  ;;  %v4330_v15 = vld [vmem:[%s5151_s21 + $0x8] sm:$0xff]  ;;  %v1101_v27 = vmul.f32 0.001, %v973_v42  ;;  %v956_v60 = vld [vmem:[%s5148_s23 + $0x300] sm:$0xff] }
  0xb6   :  { %v1445_v59 = vrot.slane %v4330_v15, %v3007_v21  ;;  %v828_v62 = vmul.f32 0.999, %v700_v8  ;;  %v829_v39 = vmul.f32 0.999, %v701_v47  ;;  %2504 = vmatprep.subr.bf16.mxu1 %v2503_v51  ;;  %1352 = vst.msk [vmem:[%s5117_s15 + $0x270] sm:$0xff] %vm528_vm0, %v1194_v45  ;;  %v957_v47 = vld [vmem:[%s5148_s23 + $0x308] sm:$0xff] }
  0xb7   :  { %1353 = vst.msk [vmem:[%s5117_s15 + $0x278] sm:$0xff] %vm528_vm0, %v1195_v54  ;;  %v2505_v16 = vpack.c.bf16 %v1195_v54, %v1194_v45  ;;  %v4348_v13 = vadd.f32 %v1100_v40, %v844_v20  ;;  %v718_v8 = vld [vmem:[%s5109_s7 + $0x390] sm:$0xff]  ;;  %v4359_v43 = vadd.f32 %v1101_v27, %v845_v32  ;;  %v1084_v51 = vmul.f32 0.001, %v956_v60  ;;  %v719_v20 = vld [vmem:[%s5109_s7 + $0x398] sm:$0xff]  ;;  %v709_v57 = vld [vmem:[%s5109_s7 + $0x348] sm:$0xff] }
  0xb8   :  { %v1453_v42 = vcombine.high %v1445_v59, %v1445_v59  ;;  %v1085_v63 = vmul.f32 0.001, %v957_v47  ;;  %v974_v45 = vld [vmem:[%s5148_s23 + $0x390] sm:$0xff]  ;;  %v846_v27 = vmul.f32 0.999, %v718_v8  ;;  %v975_v54 = vld [vmem:[%s5148_s23 + $0x398] sm:$0xff] }
  0xb9   :  { %2506 = vmatpush3.bf16.msra.mxu1 %v2505_v16  ;;  %1386 = vst.msk [vmem:[%s5117_s15 + $0x380] sm:$0xff] %vm528_vm0, %v4348_v13  ;;  %v847_v32 = vmul.f32 0.999, %v719_v20  ;;  %v702_v40 = vld [vmem:[%s5109_s7 + $0x310] sm:$0xff]  ;;  %1387 = vst.msk [vmem:[%s5117_s15 + $0x388] sm:$0xff] %vm528_vm0, %v4359_v43  ;;  %v4385_v60 = vadd.f32 %v1084_v51, %v828_v62  ;;  %v703_v20 = vld [vmem:[%s5109_s7 + $0x318] sm:$0xff] }
  0xba   :  { %1667 = vmatprep.mubr.f32.mxu1 %v1453_v42  ;;  %v4387_v47 = vadd.f32 %v1085_v63, %v829_v39  ;;  %v1102_v8 = vmul.f32 0.001, %v974_v45  ;;  %v958_v52 = vld [vmem:[%s5148_s23 + $0x310] sm:$0xff]  ;;  %v959_v33 = vld [vmem:[%s5148_s23 + $0x318] sm:$0xff]  ;;  %2539 = vmatprep.subr.bf16.mxu1 %v5128_v7  ;;  %v1103_v42 = vmul.f32 0.001, %v975_v54 }
  0xbb   :  { %v830_v62 = vmul.f32 0.999, %v702_v40  ;;  %v831_v51 = vmul.f32 0.999, %v703_v20  ;;  %1370 = vst.msk [vmem:[%s5117_s15 + $0x300] sm:$0xff] %vm528_vm0, %v4385_v60  ;;  %v720_v40 = vld [vmem:[%s5109_s7 + $0x3a0] sm:$0xff] }
  0xbc   :  { %1371 = vst.msk [vmem:[%s5117_s15 + $0x308] sm:$0xff] %vm528_vm0, %v4387_v47  ;;  %1668 = vmatmul.mubr.f32.vlgmr.msra.gmra.mrb[6].mxu1 %v1445_v59  ;;  %v4411_v39 = vadd.f32 %v1102_v8, %v846_v27  ;;  %v1086_v45 = vmul.f32 0.001, %v958_v52  ;;  %v1087_v54 = vmul.f32 0.001, %v959_v33  ;;  %v721_v20 = vld [vmem:[%s5109_s7 + $0x3a8] sm:$0xff]  ;;  %v4419_v7 = vadd.f32 %v1103_v42, %v847_v32 }
  0xbd   :  { %v848_v16 = vmul.f32 0.999, %v720_v40  ;;  %v849_v36 = vmul.f32 0.999, %v721_v20  ;;  %v976_v59 = vld [vmem:[%s5148_s23 + $0x3a0] sm:$0xff]  ;;  %v977_v33 = vld [vmem:[%s5148_s23 + $0x3a8] sm:$0xff]  ;;  %2274 = vmatprep.mubr.msk.f32.mxu1 %vm2668_vm1, %v2669_v58 }
  0xbe   :  { %1388 = vst.msk [vmem:[%s5117_s15 + $0x390] sm:$0xff] %vm528_vm0, %v4411_v39  ;;  %v4434_v52 = vadd.f32 %v1086_v45, %v830_v62  ;;  %v4436_v27 = vadd.f32 %v1087_v54, %v831_v51  ;;  %v1104_v32 = vmul.f32 0.001, %v976_v59  ;;  %v1105_v8 = vmul.f32 0.001, %v977_v33  ;;  %v704_v42 = vld [vmem:[%s5109_s7 + $0x320] sm:$0xff] }
  0xbf   :  { %v705_v58 = vld [vmem:[%s5109_s7 + $0x328] sm:$0xff]  ;;  %1389 = vst.msk [vmem:[%s5117_s15 + $0x398] sm:$0xff] %vm528_vm0, %v4419_v7  ;;  %v832_v51 = vmul.f32 0.999, %v704_v42  ;;  %v960_v54 = vld [vmem:[%s5148_s23 + $0x320] sm:$0xff]  ;;  %v723_v62 = vld [vmem:[%s5109_s7 + $0x3b8] sm:$0xff] }
  0xc0   :  { %v833_v45 = vmul.f32 0.999, %v705_v58  ;;  %v961_v40 = vld [vmem:[%s5148_s23 + $0x328] sm:$0xff]  ;;  %1372 = vst.msk [vmem:[%s5117_s15 + $0x310] sm:$0xff] %vm528_vm0, %v4434_v52  ;;  %1373 = vst.msk [vmem:[%s5117_s15 + $0x318] sm:$0xff] %vm528_vm0, %v4436_v27  ;;  %v4469_v59 = vadd.f32 %v1104_v32, %v848_v16  ;;  %v4471_v33 = vadd.f32 %v1105_v8, %v849_v36  ;;  %v722_v58 = vld [vmem:[%s5109_s7 + $0x3b0] sm:$0xff] }
  0xc1   :  { %v1088_v42 = vmul.f32 0.001, %v960_v54  ;;  %v978_v63 = vld [vmem:[%s5148_s23 + $0x3b0] sm:$0xff]  ;;  %v1089_v26 = vmul.f32 0.001, %v961_v40  ;;  %v979_v32 = vld [vmem:[%s5148_s23 + $0x3b8] sm:$0xff] }
  0xc2   :  { %v850_v38 = vmul.f32 0.999, %v722_v58  ;;  %v851_v20 = vmul.f32 0.999, %v723_v62  ;;  %1390 = vst.msk [vmem:[%s5117_s15 + $0x3a0] sm:$0xff] %vm528_vm0, %v4469_v59  ;;  %1391 = vst.msk [vmem:[%s5117_s15 + $0x3a8] sm:$0xff] %vm528_vm0, %v4471_v33 }
  0xc3   :  { %v4494_v16 = vadd.f32 %v1088_v42, %v832_v51  ;;  %v1106_v8 = vmul.f32 0.001, %v978_v63  ;;  %v706_v62 = vld [vmem:[%s5109_s7 + $0x330] sm:$0xff]  ;;  %v707_v54 = vld [vmem:[%s5109_s7 + $0x338] sm:$0xff]  ;;  %v4505_v40 = vadd.f32 %v1089_v26, %v833_v45  ;;  %v1107_v58 = vmul.f32 0.001, %v979_v32 }
  0xc4   :  { %v834_v24 = vmul.f32 0.999, %v706_v62  ;;  %v835_v36 = vmul.f32 0.999, %v707_v54  ;;  %v962_v51 = vld [vmem:[%s5148_s23 + $0x330] sm:$0xff]  ;;  %v963_v26 = vld [vmem:[%s5148_s23 + $0x338] sm:$0xff] }
  0xc5   :  { %5152 = vst [vmem:[#allocation17_spill] sm:$0xff] %v4494_v16  ;;  %5153 = vst [vmem:[#allocation18_spill] sm:$0xff] %v4505_v40  ;;  %v4512_v63 = vadd.f32 %v1106_v8, %v850_v38  ;;  %v724_v45 = vld [vmem:[%s5109_s7 + $0x3c0] sm:$0xff]  ;;  %v4530_v42 = vadd.f32 %v1107_v58, %v851_v20  ;;  %v1090_v32 = vmul.f32 0.001, %v962_v51  ;;  %v725_v62 = vld [vmem:[%s5109_s7 + $0x3c8] sm:$0xff] }
  0xc6   :  { %1374 = vst.msk [vmem:[%s5117_s15 + $0x320] sm:$0xff] %vm528_vm0, %v4494_v16  ;;  %1375 = vst.msk [vmem:[%s5117_s15 + $0x328] sm:$0xff] %vm528_vm0, %v4505_v40  ;;  %v1091_v8 = vmul.f32 0.001, %v963_v26  ;;  %v980_v54 = vld [vmem:[%s5148_s23 + $0x3c0] sm:$0xff]  ;;  %v981_v20 = vld [vmem:[%s5148_s23 + $0x3c8] sm:$0xff] }
  0xc7   :  { %5154 = vst [vmem:[#allocation19_spill] sm:$0xff] %v4512_v63  ;;  %5155 = vst [vmem:[#allocation20_spill] sm:$0xff] %v4530_v42  ;;  %v852_v11 = vmul.f32 0.999, %v724_v45  ;;  %v853_v38 = vmul.f32 0.999, %v725_v62  ;;  %v4556_v26 = vadd.f32 %v1090_v32, %v834_v24 }
  0xc8   :  { %1392 = vst.msk [vmem:[%s5117_s15 + $0x3b0] sm:$0xff] %vm528_vm0, %v4512_v63  ;;  %v708_v58 = vld [vmem:[%s5109_s7 + $0x340] sm:$0xff]  ;;  %1393 = vst.msk [vmem:[%s5117_s15 + $0x3b8] sm:$0xff] %vm528_vm0, %v4530_v42  ;;  %v4558_v45 = vadd.f32 %v1091_v8, %v835_v36  ;;  %v1108_v62 = vmul.f32 0.001, %v980_v54  ;;  %v965_v31 = vld [vmem:[%s5148_s23 + $0x348] sm:$0xff] }
  0xc9   :  { %5156 = vst [vmem:[#allocation21_spill] sm:$0xff] %v4556_v26  ;;  %v964_v48 = vld [vmem:[%s5148_s23 + $0x340] sm:$0xff]  ;;  %v1109_v50 = vmul.f32 0.001, %v981_v20  ;;  %v836_v3 = vmul.f32 0.999, %v708_v58 }
  0xca   :  { %5157 = vst [vmem:[#allocation22_spill] sm:$0xff] %v4558_v45  ;;  %v837_v51 = vmul.f32 0.999, %v709_v57  ;;  %1376 = vst.msk [vmem:[%s5117_s15 + $0x330] sm:$0xff] %vm528_vm0, %v4556_v26  ;;  %v4581_v36 = vadd.f32 %v1108_v62, %v852_v11  ;;  %v1092_v32 = vmul.f32 0.001, %v964_v48 }
  0xcb   :  { %1377 = vst.msk [vmem:[%s5117_s15 + $0x338] sm:$0xff] %vm528_vm0, %v4558_v45  ;;  %v1093_v8 = vmul.f32 0.001, %v965_v31  ;;  %v726_v57 = vld [vmem:[%s5109_s7 + $0x3d0] sm:$0xff]  ;;  %v727_v54 = vld [vmem:[%s5109_s7 + $0x3d8] sm:$0xff]  ;;  %v4592_v58 = vadd.f32 %v1109_v50, %v853_v38 }
  0xcc   :  { %5158 = vst [vmem:[#allocation23_spill] sm:$0xff] %v4581_v36  ;;  %v1958_v20 = vld [vmem:[%s5159_s26] ss:$0 sm:$0xff]  ;;  %v854_v63 = vmul.f32 0.999, %v726_v57  ;;  %v982_v31 = vld [vmem:[%s5148_s23 + $0x3d0] sm:$0xff]  ;;  %v4605_v62 = vadd.f32 %v1092_v32, %v836_v3 }
  0xcd   :  { %5160 = vst [vmem:[#allocation24_spill] sm:$0xff] %v4592_v58  ;;  %v855_v24 = vmul.f32 0.999, %v727_v54  ;;  %v983_v48 = vld [vmem:[%s5148_s23 + $0x3d8] sm:$0xff]  ;;  %1394 = vst.msk [vmem:[%s5117_s15 + $0x3c0] sm:$0xff] %vm528_vm0, %v4581_v36  ;;  %v4607_v50 = vadd.f32 %v1093_v8, %v837_v51  ;;  %v710_v54 = vld [vmem:[%s5109_s7 + $0x350] sm:$0xff] }
  0xce   :  { %v1110_v38 = vmul.f32 0.001, %v982_v31  ;;  %v1111_v57 = vmul.f32 0.001, %v983_v48  ;;  %1395 = vst.msk [vmem:[%s5117_s15 + $0x3c8] sm:$0xff] %vm528_vm0, %v4592_v58  ;;  %v711_v51 = vld [vmem:[%s5109_s7 + $0x358] sm:$0xff] }
  0xcf   :  { %v838_v32 = vmul.f32 0.999, %v710_v54  ;;  %v966_v8 = vld [vmem:[%s5148_s23 + $0x350] sm:$0xff]  ;;  %1378 = vst.msk [vmem:[%s5117_s15 + $0x340] sm:$0xff] %vm528_vm0, %v4605_v62  ;;  %1379 = vst.msk [vmem:[%s5117_s15 + $0x348] sm:$0xff] %vm528_vm0, %v4607_v50  ;;  %v729_v58 = vld [vmem:[%s5109_s7 + $0x3e8] sm:$0xff] }
  0xd0   :  { %v4637_v3 = vadd.f32 %v1110_v38, %v854_v63  ;;  %v4639_v36 = vadd.f32 %v1111_v57, %v855_v24  ;;  %v839_v16 = vmul.f32 0.999, %v711_v51  ;;  %v1094_v40 = vmul.f32 0.001, %v966_v8  ;;  %v985_v57 = vld [vmem:[%s5148_s23 + $0x3e8] sm:$0xff] }
  0xd1   :  { %v857_v38 = vmul.f32 0.999, %v729_v58  ;;  %v713_v58 = vld [vmem:[%s5109_s7 + $0x368] sm:$0xff] }
  0xd2   :  { %5161 = vst [vmem:[#allocation25_spill] sm:$0xff] %v4637_v3  ;;  %5162 = vst [vmem:[#allocation26_spill] sm:$0xff] %v4639_v36  ;;  %v4668_v51 = vadd.f32 %v1094_v40, %v838_v32  ;;  %v968_v40 = vld [vmem:[%s5148_s23 + $0x360] sm:$0xff] }
  0xd3   :  { %1396 = vst.msk [vmem:[%s5117_s15 + $0x3d0] sm:$0xff] %vm528_vm0, %v4637_v3  ;;  %1397 = vst.msk [vmem:[%s5117_s15 + $0x3d8] sm:$0xff] %vm528_vm0, %v4639_v36  ;;  %v841_v3 = vmul.f32 0.999, %v713_v58 }
  0xd4   :  { %5163 = vst [vmem:[#allocation27_spill] sm:$0xff] %v4668_v51  ;;  %1380 = vst.msk [vmem:[%s5117_s15 + $0x350] sm:$0xff] %vm528_vm0, %v4668_v51 }
 0x104   :  { %v1997_v11 = vpop.f32.mrb[0].mxu0 }
 0x105   :  { %v1998_v26 = vpop.f32.mrb[1].mxu0 }
 0x106   :  { %v2032_v45 = vpop.f32.mrb[0].mxu1  ;;  %v1999_v31 = vadd.f32 %v1998_v26, %v1997_v11  ;;  %v967_v26 = vld [vmem:[%s5148_s23 + $0x358] sm:$0xff]  ;;  %v728_v11 = vld [vmem:[%s5109_s7 + $0x3e0] sm:$0xff] }
 0x107   :  { %v2033_v48 = vpop.f32.mrb[1].mxu1  ;;  %v1095_v54 = vmul.f32 0.001, %v967_v26  ;;  %v712_v26 = vld [vmem:[%s5109_s7 + $0x360] sm:$0xff] }
 0x108   :  { %v2034_v42 = vadd.f32 %v2033_v48, %v2032_v45  ;;  %v303_v63 = vadd.f32 %v1999_v31, %v1958_v20  ;;  %v856_v45 = vmul.f32 0.999, %v728_v11  ;;  %v984_v20 = vld [vmem:[%s5148_s23 + $0x3e0] sm:$0xff]  ;;  %v1113_v48 = vmul.f32 0.001, %v985_v57  ;;  %v731_v57 = vld [vmem:[%s5109_s7 + $0x3f8] sm:$0xff] }
 0x109   :  { %v4670_v8 = vadd.f32 %v1095_v54, %v839_v16  ;;  %v1112_v31 = vmul.f32 0.001, %v984_v20  ;;  %v840_v24 = vmul.f32 0.999, %v712_v26  ;;  %v969_v16 = vld [vmem:[%s5148_s23 + $0x368] sm:$0xff]  ;;  %v730_v20 = vld [vmem:[%s5109_s7 + $0x3f0] sm:$0xff] }
 0x10a   :  { %v373_v11 = vadd.f32 %v2034_v42, %v303_v63  ;;  %v4698_v54 = vadd.f32 %v1113_v48, %v857_v38  ;;  %v1096_v63 = vmul.f32 0.001, %v968_v40  ;;  %v986_v26 = vld [vmem:[%s5148_s23 + $0x3f0] sm:$0xff]  ;;  %v1097_v58 = vmul.f32 0.001, %v969_v16  ;;  %v715_v16 = vld [vmem:[%s5109_s7 + $0x378] sm:$0xff] }
 0x10b   :  { %1381 = vst.msk [vmem:[%s5117_s15 + $0x358] sm:$0xff] %vm528_vm0, %v4670_v8  ;;  %v4696_v32 = vadd.f32 %v1112_v31, %v856_v45  ;;  %v858_v36 = vmul.f32 0.999, %v730_v20  ;;  %v859_v42 = vmul.f32 0.999, %v731_v57  ;;  %v987_v31 = vld [vmem:[%s5148_s23 + $0x3f8] sm:$0xff] }
 0x10c   :  { %5165 = vst [vmem:[#allocation29_spill] sm:$0xff] %v4698_v54  ;;  %1399 = vst.msk [vmem:[%s5117_s15 + $0x3e8] sm:$0xff] %vm528_vm0, %v4698_v54  ;;  %v4721_v38 = vadd.f32 %v1096_v63, %v840_v24  ;;  %v1114_v48 = vmul.f32 0.001, %v986_v26  ;;  %v714_v40 = vld [vmem:[%s5109_s7 + $0x370] sm:$0xff]  ;;  %v4732_v20 = vadd.f32 %v1097_v58, %v841_v3  ;;  %v971_v3 = vld [vmem:[%s5148_s23 + $0x378] sm:$0xff] }
 0x10d   :  { %5164 = vst [vmem:[#allocation28_spill] sm:$0xff] %v4696_v32  ;;  %1398 = vst.msk [vmem:[%s5117_s15 + $0x3e0] sm:$0xff] %vm528_vm0, %v4696_v32  ;;  %v1115_v57 = vmul.f32 0.001, %v987_v31  ;;  %v842_v51 = vmul.f32 0.999, %v714_v40 }
 0x10e   :  { %v843_v45 = vmul.f32 0.999, %v715_v16  ;;  %1382 = vst.msk [vmem:[%s5117_s15 + $0x360] sm:$0xff] %vm528_vm0, %v4721_v38  ;;  %v4739_v24 = vadd.f32 %v1114_v48, %v858_v36  ;;  %v970_v63 = vld [vmem:[%s5148_s23 + $0x370] sm:$0xff]  ;;  %1383 = vst.msk [vmem:[%s5117_s15 + $0x368] sm:$0xff] %vm528_vm0, %v4732_v20  ;;  %v2533_v26 = vpack.c.bf16 %v4732_v20, %v4721_v38  ;;  %v2558_v38 = vld [vmem:[%s5151_s21] sm:$0xff] }
 0x10f   :  { %v1243_v58 = vadd.f32 %v1115_v57, %v859_v42  ;;  %v1098_v36 = vmul.f32 0.001, %v970_v63  ;;  %v1099_v31 = vmul.f32 0.001, %v971_v3  ;;  %v1421_v20 = vcombine.high %v2558_v38, %v2558_v38 }
 0x110   :  { %1400 = vst.msk [vmem:[%s5117_s15 + $0x3f0] sm:$0xff] %vm528_vm0, %v4739_v24  ;;  %v5168_v38 = vpack.c.bf16 %v3709_v49, %v3699_v28  ;;  %v5175_v28 = vpack.c.bf16 %v4067_v30, %v4056_v41  ;;  %v5176_v49 = vpack.c.bf16 %v4092_v10, %v4074_v44  ;;  %v5187_v41 = vld [vmem:[#allocation17_spill] sm:$0xff]  ;;  %v5189_v44 = vld [vmem:[#allocation20_spill] sm:$0xff]  ;;  %v5190_v10 = vld [vmem:[#allocation19_spill] sm:$0xff] }
 0x111   :  { %1401 = vst.msk [vmem:[%s5117_s15 + $0x3f8] sm:$0xff] %vm528_vm0, %v1243_v58  ;;  %v2535_v48 = vpack.c.bf16 %v1243_v58, %v4739_v24  ;;  %v1226_v40 = vadd.f32 %v1098_v36, %v842_v51  ;;  %v1227_v16 = vadd.f32 %v1099_v31, %v843_v45  ;;  %v1435_v58 = vrot.slane %v1421_v20, %v3007_v21 }
 0x113   :  { %1384 = vst.msk [vmem:[%s5117_s15 + $0x370] sm:$0xff] %vm528_vm0, %v1226_v40  ;;  %1385 = vst.msk [vmem:[%s5117_s15 + $0x378] sm:$0xff] %vm528_vm0, %v1227_v16  ;;  %v2537_v42 = vpack.c.bf16 %v1227_v16, %v1226_v40  ;;  %v1437_v32 = vcombine.high %v1435_v58, %v1435_v58  ;;  %v5166_v40 = vpack.c.bf16 %v3620_v37, %v3618_v6 }
 0x114   :  { %v5167_v16 = vpack.c.bf16 %v3685_v34, %v3675_v4  ;;  %v5171_v6 = vpack.c.bf16 %v3865_v9, %v3863_v0  ;;  %v5172_v37 = vpack.c.bf16 %v3897_v18, %v3895_v56  ;;  %v5173_v4 = vpack.c.bf16 %v3968_v46, %v3966_v29 }
 0x115   :  { %v5174_v34 = vpack.c.bf16 %v3999_v55, %v3991_v2  ;;  %v5179_v0 = vpack.c.bf16 %v4256_v12, %v4254_v35  ;;  %v5180_v9 = vpack.c.bf16 %v4287_v25, %v4279_v19  ;;  %v5181_v18 = vpack.c.bf16 %v4359_v43, %v4348_v13  ;;  %v5186_v55 = vld [vmem:[#allocation18_spill] sm:$0xff]  ;;  %v5196_v35 = vld [vmem:[#allocation23_spill] sm:$0xff] }
 0x116   :  { %v5182_v29 = vpack.c.bf16 %v4387_v47, %v4385_v60  ;;  %v5184_v46 = vpack.c.bf16 %v4436_v27, %v4434_v52  ;;  %v5185_v2 = vpack.c.bf16 %v4471_v33, %v4469_v59  ;;  %v5188_v30 = vpack.c.bf16 %v5186_v55, %v5187_v41  ;;  %v5199_v25 = vld [vmem:[#allocation26_spill] sm:$0xff]  ;;  %v5202_v43 = vld [vmem:[#allocation27_spill] sm:$0xff]  ;;  %v5204_v47 = vld [vmem:[#allocation29_spill] sm:$0xff] }
 0x117   :  { %v5198_v19 = vpack.c.bf16 %v4607_v50, %v4605_v62  ;;  %v5203_v60 = vpack.c.bf16 %v4670_v8, %v5202_v43  ;;  %v1249_v62 = vld [vmem:[%s5111_s9] sm:$0xff]  ;;  %v1250_v50 = vld [vmem:[%s5111_s9 + $0x8] sm:$0xff]  ;;  %v1831_v43 = vld [vmem:[%s5113_s11 + $0x38] sm:$0xff] }
 0x118   :  { %v1257_v8 = vld [vmem:[%s5107_s5] sm:$0xff]  ;;  %1839 = vst.msk [vmem:[%s5116_s14 + $0x38] sm:$0xff] %vm1404_vm2, %v1831_v43  ;;  %1854 = vst.msk [vmem:[%s5121_s19 + $0x38] sm:$0xff] %vm1404_vm2, %v1831_v43 }
 0x124   :  { %v2067_v57 = vpop.f32.mrb[2].mxu0 }
 0x125   :  { %v2068_v24 = vpop.f32.mrb[3].mxu0 }
 0x126   :  { %v2102_v51 = vpop.f32.mrb[2].mxu1  ;;  %v2069_v45 = vadd.f32 %v2068_v24, %v2067_v57 }
 0x127   :  { %v2103_v63 = vpop.f32.mrb[3].mxu1 }
 0x128   :  { %v2104_v3 = vadd.f32 %v2103_v63, %v2102_v51  ;;  %v443_v36 = vadd.f32 %v2069_v45, %v373_v11  ;;  %v5169_v11 = vpack.c.bf16 %v3779_v23, %v3768_v17  ;;  %v1438_v17 = vcombine.high %v4330_v15, %v4330_v15  ;;  %v5200_v15 = vld [vmem:[#allocation25_spill] sm:$0xff]  ;;  %v1252_v45 = vld [vmem:[%s5111_s9 + $0x18] sm:$0xff] }
 0x129   :  { %v5177_v23 = vpack.c.bf16 %v4153_v14, %v4151_v53  ;;  %v5191_v53 = vpack.c.bf16 %v5189_v44, %v5190_v10  ;;  %v5192_v14 = vld [vmem:[#allocation22_spill] sm:$0xff]  ;;  %v5201_v13 = vpack.c.bf16 %v5199_v25, %v5200_v15  ;;  %v1251_v51 = vld [vmem:[%s5111_s9 + $0x10] sm:$0xff]  ;;  %v1828_v25 = vld [vmem:[%s5113_s11 + $0x20] sm:$0xff] }
 0x12a   :  { %v513_v31 = vadd.f32 %v2104_v3, %v443_v36  ;;  %v1259_v63 = vld [vmem:[%s5107_s5 + $0x10] sm:$0xff]  ;;  %v1255_v3 = vmul.f32 0.999, %v1251_v51  ;;  %v1260_v36 = vld [vmem:[%s5107_s5 + $0x18] sm:$0xff]  ;;  %v1829_v15 = vld [vmem:[%s5113_s11 + $0x28] sm:$0xff]  ;;  %1836 = vst.msk [vmem:[%s5116_s14 + $0x20] sm:$0xff] %vm1404_vm2, %v1828_v25 }
 0x12b   :  { %1837 = vst.msk [vmem:[%s5116_s14 + $0x28] sm:$0xff] %vm1404_vm2, %v1829_v15  ;;  %1851 = vst.msk [vmem:[%s5121_s19 + $0x20] sm:$0xff] %vm1404_vm2, %v1828_v25 }
 0x12c   :  { %v516_v54 = vmax.f32 %v513_v31, 0.0  ;;  %1852 = vst.msk [vmem:[%s5121_s19 + $0x28] sm:$0xff] %vm1404_vm2, %v1829_v15 }
 0x12e   :  { %2264 = vmatmul.mubr.msk.f32.vlgmr.msra.gmra.mrb[4].mxu0 %vm528_vm0, %v516_v54  ;;  %v5170_v54 = vpack.c.bf16 %v3804_v61, %v3786_v22  ;;  %v5178_v22 = vpack.c.bf16 %v4185_v5, %v4183_v1  ;;  %v1452_v61 = vrot.slane %v1438_v17, %v3007_v21  ;;  %v5183_v21 = vpack.c.bf16 %v4419_v7, %v4411_v39  ;;  %v5193_v1 = vld [vmem:[#allocation21_spill] sm:$0xff]  ;;  %v5195_v5 = vld [vmem:[#allocation24_spill] sm:$0xff] }
 0x12f   :  { %2446 = vmatpush3.bf16.msra.mxu0 %v5166_v40  ;;  %1597 = vmatprep.mubr.f32.mxu0 %v1437_v32  ;;  %v5194_v7 = vpack.c.bf16 %v5192_v14, %v5193_v1  ;;  %v5197_v12 = vpack.c.bf16 %v5195_v5, %v5196_v35  ;;  %v5205_v39 = vld [vmem:[#allocation28_spill] sm:$0xff]  ;;  %v1253_v32 = vmul.f32 0.999, %v1249_v62  ;;  %v1263_v40 = vmul.f32 0.001, %v1259_v63  ;;  %v1824_v5 = vld [vmem:[%s5113_s11] sm:$0xff] }
 0x130   :  { %2448 = vmatprep.subr.bf16.mxu0 %v5167_v16  ;;  %v1454_v56 = vcombine.high %v1452_v61, %v1452_v61  ;;  %v5206_v52 = vpack.c.bf16 %v5204_v47, %v5205_v39  ;;  %v1264_v16 = vmul.f32 0.001, %v1260_v36  ;;  %v1825_v35 = vld [vmem:[%s5113_s11 + $0x8] sm:$0xff]  ;;  %1832 = vst.msk [vmem:[%s5116_s14] sm:$0xff] %vm1404_vm2, %v1824_v5  ;;  %1847 = vst.msk [vmem:[%s5121_s19] sm:$0xff] %vm1404_vm2, %v1824_v5 }
 0x131   :  { %1833 = vst.msk [vmem:[%s5116_s14 + $0x8] sm:$0xff] %vm1404_vm2, %v1825_v35  ;;  %1848 = vst.msk [vmem:[%s5121_s19 + $0x8] sm:$0xff] %vm1404_vm2, %v1825_v35  ;;  %v1271_v47 = vld [vmem:[%s5108_s6] sm:$0x1] }
 0x133   :  { %2450 = vmatpush3.bf16.msra.mxu0 %v5168_v38  ;;  %v1267_v38 = vadd.f32 %v1263_v40, %v1255_v3 }
 0x134   :  { %2452 = vmatprep.subr.bf16.mxu0 %v5169_v11 }
 0x135   :  { %1407 = vst.msk [vmem:[%s5119_s17 + $0x10] sm:$0xff] %vm1404_vm2, %v1267_v38 }
 0x137   :  { %2454 = vmatpush3.bf16.msra.mxu0 %v5170_v54  ;;  %v5207_v54 = vmov 0.0|0.0  }
 0x138   :  { %2456 = vmatprep.subr.bf16.mxu0 %v5171_v6 }
 0x13b   :  { %2458 = vmatpush3.bf16.msra.mxu0 %v5172_v37 }
 0x13c   :  { %2460 = vmatprep.subr.bf16.mxu0 %v5173_v4 }
 0x13f   :  { %2462 = vmatpush3.bf16.msra.mxu0 %v5174_v34 }
 0x140   :  { %2464 = vmatprep.subr.bf16.mxu0 %v5175_v28  ;;  %v1959_v28 = vld [vmem:[%s5108_s6] ss:$0 sm:$0xff]  ;;  %s5209_s6 = sld [smem:[#allocation30_spill]] }
 0x143   :  { %2466 = vmatpush3.bf16.msra.mxu0 %v5176_v49 }
 0x144   :  { %2468 = vmatprep.subr.bf16.mxu0 %v5177_v23 }
 0x146   :  { %s1858_s21 = sadd.s32 2, %s5209_s6 }
 0x147   :  { %2470 = vmatpush3.bf16.msra.mxu0 %v5178_v22  ;;  %v1244_v22 = vld [vmem:[%s5110_s8] sm:$0x1]  ;;  %p1859_p0 = scmp.lt.s32.totalorder %s1858_s21, 0 }
 0x148   :  { %2472 = vmatprep.subr.bf16.mxu0 %v5179_v0  ;;  %v1245_v0 = vmul.f32 0.999, %v1244_v22 }
 0x14b   :  { %2474 = vmatpush3.bf16.msra.mxu0 %v5180_v9 }
 0x14c   :  { %2508 = vmatprep.subr.bf16.mxu0 %v5181_v18  ;;  %v2142_v27 = vpop.f32.mrb[4].mxu1  ;;  %v5208_v18 = vld [vmem:[#allocation16_spill] sm:$0xff] }
 0x14d   :  { %v2143_v59 = vpop.f32.mrb[5].mxu1 }
 0x14e   :  { %1598 = vmatmul.mubr.f32.vlgmr.msra.gmra.mrb[6].mxu0 %v1435_v58  ;;  %v2144_v33 = vadd.f32 %v2143_v59, %v2142_v27  ;;  %v1256_v58 = vmul.f32 0.999, %v1252_v45 }
 0x14f   :  { %2510 = vmatpush3.bf16.msra.mxu0 %v5182_v29  ;;  %1737 = vmatprep.mubr.f32.mxu0 %v1454_v56  ;;  %v1416_v29 = vsub.s32 0, %v5208_v18 }
 0x150   :  { %2512 = vmatprep.subr.bf16.mxu0 %v5183_v21  ;;  %v1268_v11 = vadd.f32 %v1264_v16, %v1256_v58 }
 0x152   :  { %v2543_v6 = vpack.c.bf16 %v1268_v11, %v1267_v38  ;;  %1408 = vst.msk [vmem:[%s5119_s17 + $0x18] sm:$0xff] %vm1404_vm2, %v1268_v11 }
 0x153   :  { %2514 = vmatpush3.bf16.msra.mxu0 %v5184_v46 }
 0x154   :  { %2516 = vmatprep.subr.bf16.mxu0 %v5185_v2 }
 0x157   :  { %2518 = vmatpush3.bf16.msra.mxu0 %v5188_v30 }
 0x158   :  { %2520 = vmatprep.subr.bf16.mxu0 %v5191_v53 }
 0x15b   :  { %2522 = vmatpush3.bf16.msra.mxu0 %v5194_v7 }
 0x15c   :  { %2524 = vmatprep.subr.bf16.mxu0 %v5197_v12  ;;  %v1826_v12 = vld [vmem:[%s5113_s11 + $0x10] sm:$0xff] }
 0x15d   :  { %1834 = vst.msk [vmem:[%s5116_s14 + $0x10] sm:$0xff] %vm1404_vm2, %v1826_v12  ;;  %1849 = vst.msk [vmem:[%s5121_s19 + $0x10] sm:$0xff] %vm1404_vm2, %v1826_v12 }
 0x15f   :  { %2526 = vmatpush3.bf16.msra.mxu0 %v5198_v19  ;;  %v1827_v19 = vld [vmem:[%s5113_s11 + $0x18] sm:$0xff] }
 0x160   :  { %2528 = vmatprep.subr.bf16.mxu0 %v5201_v13  ;;  %v1830_v13 = vld [vmem:[%s5113_s11 + $0x30] sm:$0xff]  ;;  %1835 = vst.msk [vmem:[%s5116_s14 + $0x18] sm:$0xff] %vm1404_vm2, %v1827_v19  ;;  %1850 = vst.msk [vmem:[%s5121_s19 + $0x18] sm:$0xff] %vm1404_vm2, %v1827_v19  ;;  %s1889_s11 = sshll.u32 %s2670_s22, 4  ;;  %s1890_s11 = int_to_ptr.vmem [resolvable:$true] %s1889_s11 }
 0x161   :  { %1838 = vst.msk [vmem:[%s5116_s14 + $0x30] sm:$0xff] %vm1404_vm2, %v1830_v13  ;;  %1853 = vst.msk [vmem:[%s5121_s19 + $0x30] sm:$0xff] %vm1404_vm2, %v1830_v13  ;;  %s2560_s24 = scalar_lea.vmem %s1890_s11, 32  ;;  %p2565_p3 = scmp.lt.s32.totalorder %s1890_s11, %s1890_s11 }
 0x162   :  { %p2561_p2 = scmp.ne.s32.totalorder %s1890_s11, %s2560_s24  ;;  %p2566_p4 = scmp.lt.s32.totalorder %s2560_s24, %s2560_s24 }
 0x163   :  { %2530 = vmatpush3.bf16.msra.mxu0 %v5203_v60  ;;  %v1269_v60 = vld [vmem:[%s5112_s10] sm:$0x1] }
 0x164   :  { %2532 = vmatprep.subr.bf16.mxu0 %v5206_v52  ;;  %v1270_v39 = vmul.f32 0.999, %v1269_v60  ;;  %v1272_v52 = vmul.f32 0.001, %v1271_v47  ;;  %p2567_p5 = por %p2566_p4, %p2565_p3 }
 0x166   :  { %v1273_v27 = vadd.f32 %v1272_v52, %v1270_v39  ;;  %p2568_p6 = pnand %p2567_p5, %p2561_p2 }
 0x167   :  { %2534 = vmatpush3.bf16.msra.mxu0 %v2533_v26  ;;  %v1254_v26 = vmul.f32 0.999, %v1250_v50 }
 0x168   :  { %2536 = vmatprep.subr.bf16.mxu0 %v2535_v48  ;;  %v1258_v48 = vld [vmem:[%s5107_s5 + $0x8] sm:$0xff]  ;;  %v1748_v59 = vrot.slane %v1273_v27, %v1416_v29  ;;  %s1860_s5 = ssub.s32 0, %s1858_s21 }
 0x169   :  { %v1262_v20 = vmul.f32 0.001, %v1258_v48  ;;  %s1962_s30 = smin.u32 %s1860_s5, %s1858_s21 }
 0x16a   :  { %s1862_s0 = sand.u32 63, %s1962_s30  }
 0x16b   :  { %2538 = vmatpush3.bf16.msra.mxu0 %v2537_v42  ;;  %v1261_v42 = vmul.f32 0.001, %v1257_v8  ;;  %v1266_v24 = vadd.f32 %v1262_v20, %v1254_v26  ;;  %s1863_s7 = ssub.s32 0, %s1862_s0 }
 0x16c   :  { %s5211_s7 = smov (!%p1859_p0, %s1863_s7), %s1862_s0 }
 0x16d   :  { %v1265_v57 = vadd.f32 %v1261_v42, %v1253_v32  ;;  %1406 = vst.msk [vmem:[%s5119_s17 + $0x8] sm:$0xff] %vm1404_vm2, %v1266_v24  ;;  %p1964_p1 = scmp.lt.s32.totalorder %s5211_s7, 0 }
 0x16e   :  { %1738 = vmatmul.mubr.f32.vlgmr.msra.gmra.mrb[8].mxu0 %v1452_v61  ;;  %v1246_v61 = vld [vmem:[%s5159_s26] sm:$0x1] }
 0x16f   :  { %v2540_v31 = vpack.c.bf16 %v1266_v24, %v1265_v57  ;;  %1405 = vst.msk [vmem:[%s5119_s17] sm:$0xff] %vm1404_vm2, %v1265_v57  ;;  %v1247_v9 = vmul.f32 0.001, %v1246_v61 }
 0x171   :  { %2541 = vmatpush3.bf16.msra.mxu1 %v2540_v31  ;;  %v4915_v56 = vadd.f32 %v1247_v9, %v1245_v0 }
 0x172   :  { %2542 = vmatprep.subr.bf16.mxu1 %v5207_v54 }
 0x173   :  { %v1417_v21 = vrot.slane %v4915_v56, %v1416_v29 }
 0x175   :  { %2544 = vmatpush3.bf16.msra.mxu1 %v2543_v6  ;;  %v1530_v46 = vadd.f32 %v2144_v33, %v1417_v21 }
 0x18f   :  { %v2212_v37 = vpop.f32.mrb[6].mxu1 }
 0x190   :  { %v2213_v4 = vpop.f32.mrb[7].mxu1 }
 0x191   :  { %v2214_v34 = vadd.f32 %v2213_v4, %v2212_v37 }
 0x201   :  { %v598_v49 = vpop.f32.mrb[4].mxu0 }
 0x202   :  { %v599_v17 = vadd.f32 %v1959_v28, %v598_v49  ;;  %v2265_v23 = vpop.f32.mrb[5].mxu0 }
 0x204   :  { %603 = vst.msk [vmem:[#allocation3] sm:$0x3] %vm602_vm3, %v599_v17 }
 0x221   :  { %v2177_v2 = vpop.f32.mrb[6].mxu0 }
 0x222   :  { %v2178_v55 = vpop.f32.mrb[7].mxu0 }
 0x223   :  { %v2179_v41 = vadd.f32 %v2178_v55, %v2177_v2 }
 0x225   :  { %v1600_v30 = vadd.f32 %v2179_v41, %v1530_v46 }
 0x227   :  { %v1670_v44 = vadd.f32 %v2214_v34, %v1600_v30 }
 0x241   :  { %v2247_v10 = vpop.f32.mrb[8].mxu0 }
 0x242   :  { %v2248_v53 = vpop.f32.mrb[9].mxu0 }
 0x243   :  { %v2249_v14 = vadd.f32 %v2248_v53, %v2247_v10 }
 0x245   :  { %v1740_v1 = vadd.f32 %v2249_v14, %v1670_v44 }
 0x247   :  { %v1743_v7 = vmax.f32 %v1740_v1, 0.0 }
 0x249   :  { %2275 = vmatmul.mubr.msk.f32.vlgmr.msra.gmra.mrb[8].mxu1 %vm528_vm0, %v1743_v7 }
 0x31c   :  { %v1819_v33 = vpop.f32.mrb[8].mxu1 }
 0x31d   :  { %v5014_v62 = vadd.f32 %v1819_v33, %v1748_v59  ;;  %v2276_v50 = vpop.f32.mrb[9].mxu1 }
 0x31f   :  { %v1840_v8 = vmul.f32 %v5014_v62, %v5014_v62  ;;  %1823 = vst.msk [vmem:[#allocation6] sm:$0x3] %vm602_vm3, %v5014_v62 }
 0x321   :  { %v1841_v32 = vsel %vm602_vm3, %v1840_v8, 0.0 }
 0x322   :  { %1842 = vadd.xlane.f32.xlu0 %v1841_v32 }
 0x323   :  { %2571 = shalt.err (!%p2568_p6)
}
 0x324   :  { %s2572_s25 = scalar_lea.hbm %s5115_s13, 32 }
 0x325   :  { %p2573_p7 = scmp.ne.s32.totalorder %s5115_s13, %s2572_s25  ;;  %p2576_p8 = scmp.lt.u32.totalorder %s2572_s25, %s5115_s13 }
 0x327   :  { %p2578_p9 = pnand %p2576_p8, %p2573_p7 }
 0x329   :  { %2581 = shalt.err (!%p2578_p9)
}
 0x32a   :  { %1892 = dma.vmem_to_hbm [thread:$0]  %s1890_s11, 32, %s5115_s13, [#allocation7]   ;;  %1403 = vst.msk [vmem:[#allocation8] sm:$0x1] %vm1402_vm4, %v4915_v56 }
 0x32b   :  { %1410 = vst.msk [vmem:[#allocation9] sm:$0x1] %vm1409_vm5, %v1273_v27  ;;  %s2671_s28 = smov [#allocation3]   ;;  %s2672_s29 = smov [#allocation8]  }
 0x32c   :  { %s1879_s4 = sshll.u32 %s2671_s28, 4  ;;  %s1903_s9 = sshll.u32 %s2672_s29, 4  ;;  %s1880_s4 = int_to_ptr.vmem [resolvable:$true] %s1879_s4  ;;  %s1904_s9 = int_to_ptr.vmem [resolvable:$true] %s1903_s9 }
 0x32d   :  { %s2582_s15 = scalar_lea.vmem %s1880_s4, 32  ;;  %p2587_p11 = scmp.lt.s32.totalorder %s1880_s4, %s1880_s4 }
 0x32e   :  { %p2583_p10 = scmp.ne.s32.totalorder %s1880_s4, %s2582_s15  ;;  %p2588_p12 = scmp.lt.s32.totalorder %s2582_s15, %s2582_s15 }
 0x330   :  { %p2589_p13 = por %p2588_p12, %p2587_p11 }
 0x332   :  { %p2590_p0 = pnand %p2589_p13, %p2583_p10 }
 0x334   :  { %2593 = shalt.err (!%p2590_p0)
}
 0x335   :  { %s2594_s13 = scalar_lea.hbm %s5114_s12, 32 }
 0x336   :  { %p2595_p2 = scmp.ne.s32.totalorder %s5114_s12, %s2594_s13  ;;  %p2598_p3 = scmp.lt.u32.totalorder %s2594_s13, %s5114_s12 }
 0x338   :  { %p2600_p4 = pnand %p2598_p3, %p2595_p2 }
 0x33a   :  { %2603 = shalt.err (!%p2600_p4)
}
 0x33b   :  { %1882 = dma.vmem_to_hbm [thread:$0]  %s1880_s4, 32, %s5114_s12, [#allocation4]  }
 0x33c   :  { %s2604_s24 = scalar_lea.vmem %s1904_s9, 16  ;;  %s2608_s2 = scalar_lea.vmem %s1904_s9, 32 }
 0x33d   :  { %p2605_p5 = scmp.ne.s32.totalorder %s1904_s9, %s2604_s24  ;;  %p2609_p6 = scmp.lt.s32.totalorder %s1904_s9, %s1904_s9 }
 0x33e   :  { %p2610_p7 = scmp.lt.s32.totalorder %s2608_s2, %s2604_s24 }
 0x340   :  { %p2611_p8 = por %p2610_p7, %p2609_p6 }
 0x342   :  { %p2612_p9 = pnand %p2611_p8, %p2605_p5 }
 0x344   :  { %2615 = shalt.err (!%p2612_p9)
}
 0x345   :  { %s2616_s3 = scalar_lea.hbm %s5118_s16, 16 }
 0x346   :  { %p2617_p10 = scmp.ne.s32.totalorder %s5118_s16, %s2616_s3  ;;  %p2620_p11 = scmp.lt.u32.totalorder %s2616_s3, %s5118_s16 }
 0x348   :  { %p2622_p12 = pnand %p2620_p11, %p2617_p10 }
 0x34a   :  { %2625 = shalt.err (!%p2622_p12)
}
 0x34b   :  { %1906 = dma.vmem_to_hbm [thread:$0]  %s1904_s9, 16, %s5118_s16, [#allocation7]  }
 0x34c   :  { %s2673_s28 = smov [#allocation9]   ;;  %s1869_s29 = sadd.s32 64, %s5211_s7 }
 0x34d   :  { %s1915_s4 = sshll.u32 %s2673_s28, 4  ;;  %s1916_s4 = int_to_ptr.vmem [resolvable:$true] %s1915_s4 }
 0x34e   :  { %s2626_s15 = scalar_lea.vmem %s1916_s4, 16  ;;  %s2630_s10 = scalar_lea.vmem %s1916_s4, 32 }
 0x34f   :  { %p2627_p13 = scmp.ne.s32.totalorder %s1916_s4, %s2626_s15  ;;  %p2631_p0 = scmp.lt.s32.totalorder %s1916_s4, %s1916_s4 }
 0x350   :  { %p2632_p2 = scmp.lt.s32.totalorder %s2630_s10, %s2626_s15 }
 0x352   :  { %p2633_p3 = por %p2632_p2, %p2631_p0 }
 0x354   :  { %p2634_p4 = pnand %p2633_p3, %p2627_p13 }
 0x356   :  { %2637 = shalt.err (!%p2634_p4)
}
 0x357   :  { %s2638_s21 = scalar_lea.hbm %s5120_s18, 16 }
 0x358   :  { %p2639_p5 = scmp.ne.s32.totalorder %s5120_s18, %s2638_s21  ;;  %p2642_p6 = scmp.lt.u32.totalorder %s2638_s21, %s5120_s18 }
 0x35a   :  { %p2644_p7 = pnand %p2642_p6, %p2639_p5 }
 0x35c   :  { %2647 = shalt.err (!%p2644_p7)
}
 0x35d   :  { %1918 = dma.vmem_to_hbm [thread:$0]  %s1916_s4, 16, %s5120_s18, [#allocation10]  }
 0x35e   :  { %s5213_s29 = smov (!%p1964_p1, %s1869_s29), %s5211_s7  ;;  %s2648_s2 = scalar_lea.hbm %s5122_s20, 16 }
 0x35f   :  { %1872 = sst [smem:[#allocation11]] %s5213_s29  ;;  %p2649_p8 = scmp.ne.s32.totalorder %s5122_s20, %s2648_s2 }
 0x360   :  { %p2652_p9 = scmp.lt.u32.totalorder %s2648_s2, %s5122_s20 }
 0x362   :  { %p2654_p10 = pnand %p2652_p9, %p2649_p8 }
 0x364   :  { %2657 = shalt.err (!%p2654_p10)
}
 0x365   :  { %s2674_s8 = smov [#allocation11]   ;;  %s1856_s28 = scalar_lea.vmem %s5121_s19, %s5209_s6 }
 0x366   :  { %1928 = dma.smem_to_hbm %s2674_s8, 16, %s5122_s20, [#allocation5]  }
 0x3af   :  { %v1843_v26 = vpop.xlane.xlu0 %1842 }
 0x3b0   :  { %v1844_v48 = vmax.f32 %v1843_v26, 1e-24 }
 0x3b2   :  { %2556 = vrsqrt.f32 %v1844_v48 }
 0x3bc   :  { %v2557_v42 = vpop.eup %2556 }
 0x3bd   :  { %v1846_v20 = vmul.f32 %v2557_v42, %v5014_v62 }
 0x3bf   :  { %1857 = vst.msk [vmem:[%s1856_s28] sm:$0x3] %vm602_vm3, %v1846_v20 }
 0x3c0   :  { %2658 = dma.done.wait [#allocation4], 32  }
 0x3c1   :  { %2659 = vsyncadd [#allocation4], 4294967264 }
 0x3c2   :  { %2660 = dma.done.wait [#allocation7], 48  }
 0x3c3   :  { %2661 = vsyncadd [#allocation7], 4294967248 }
 0x3c4   :  { %2662 = dma.done.wait [#allocation10], 16  }
 0x3c5   :  { %2663 = vsyncadd [#allocation10], 4294967280 }
 0x3c6   :  { %2664 = dma.done.wait [#allocation5], 16  }
 0x3c7   :  { %2665 = vsyncadd [#allocation5], 4294967280 }
 0x3c8   :  { %1952 = sfence }
 0x3c9   :  { %1953 = vsyncpa [#allocation4], 1 }
 0x3ca   :  { %1954 = vsyncpa [#allocation7], 1 }
 0x3cb   :  { %1955 = vsyncpa [#allocation10], 1 }
 0x3cc   :  { %1956 = vsyncpa [#allocation5], 1 }

</bundles_post_ra>
